<compile_context>
chip_gen: v7x
topology: tpu7x:2x2x1
jax: 0.10.0
libtpu: 0.0.40
codegen_flags: <defaults>
</compile_context>

<pallas_src>
import functools

import jax
import jax.numpy as jnp
from jax.experimental import pallas as pl
from jax.experimental.pallas import tpu as pltpu

LANE = 128
_VMEM_LIMIT = 32 * 1024 * 1024  # safe on v5e/v6e/v7x; actual per-call use is well below this


def _round_up(x, m):
    return (x + m - 1) // m * m


def _pick_tile_n(cout_p):
    for cand in (512, 256, 128):
        if cout_p % cand == 0:
            return cand
    return cout_p


def _pick_tile_k(k):
    # k is always a multiple of 128 (channels are lane-padded).
    if k <= 2048:
        return k
    for div in (3, 9):
        if k % div == 0 and (k // div) % 128 == 0 and (k // div) <= 2048:
            return k // div
    return 128


# ----------------------------------------------------------------------------
# Pallas kernels
# ----------------------------------------------------------------------------

def _conv_matmul_kernel(p_ref, w_ref, b_ref, o_ref, acc_ref, *, apply_relu):
    """Tiled (M,K)@(K,Cout) with K-reduction accumulator + fused bias/ReLU epilogue."""
    k = pl.program_id(2)

    @pl.when(k == 0)
    def _():
        acc_ref[...] = jnp.zeros_like(acc_ref)

    acc_ref[...] += jnp.dot(p_ref[...], w_ref[...],
                            preferred_element_type=jnp.float32)

    @pl.when(k == pl.num_programs(2) - 1)
    def _():
        out = acc_ref[...] + b_ref[...]
        if apply_relu:
            out = jnp.maximum(out, 0.0)
        o_ref[...] = out.astype(o_ref.dtype)


def _relu_kernel(x_ref, o_ref):
    o_ref[...] = jnp.maximum(x_ref[...], 0)


def _maxpool_kernel(x_ref, o_ref, *, c):
    # x block: (tb, 2, Wo, 2*c)  -- row pair in dim 1, column pair packed in lanes.
    x = x_ref[...]
    rows = jnp.maximum(x[:, 0], x[:, 1])                 # (tb, Wo, 2*c)
    o_ref[...] = jnp.maximum(rows[:, :, :c], rows[:, :, c:])  # (tb, Wo, c)


# ----------------------------------------------------------------------------
# Pallas wrappers
# ----------------------------------------------------------------------------

def _conv_matmul(patches, w2d, bias2d, apply_relu):
    """patches (M, K) bf16, w2d (K, Cout_p) bf16, bias2d (1, Cout_p) f32 -> (M, Cout_p) bf16."""
    M, K = patches.shape
    Cout_p = w2d.shape[1]
    tn = _pick_tile_n(Cout_p)
    tk = _pick_tile_k(K)
    tm = min(512, _round_up(M, 8))
    grid = (pl.cdiv(M, tm), Cout_p // tn, K // tk)

    kernel = functools.partial(_conv_matmul_kernel, apply_relu=apply_relu)
    return pl.pallas_call(
        kernel,
        out_shape=jax.ShapeDtypeStruct((M, Cout_p), jnp.bfloat16),
        grid=grid,
        in_specs=[
            pl.BlockSpec((tm, tk), lambda i, j, k: (i, k)),
            pl.BlockSpec((tk, tn), lambda i, j, k: (k, j)),
            pl.BlockSpec((1, tn), lambda i, j, k: (0, j)),
        ],
        out_specs=pl.BlockSpec((tm, tn), lambda i, j, k: (i, j)),
        scratch_shapes=[pltpu.VMEM((tm, tn), jnp.float32)],
        compiler_params=pltpu.CompilerParams(
            dimension_semantics=("parallel", "parallel", "arbitrary"),
            vmem_limit_bytes=_VMEM_LIMIT),
    )(patches, w2d, bias2d)


def conv3x3_bias_act(x_nhwc, w_oihw, bias, apply_relu):
    """3x3 conv, stride 1, pad 1 (PyTorch Conv2d semantics), NHWC, lane-padded channels."""
    N, H, W, Cp_in = x_nhwc.shape
    Cout, Cin = w_oihw.shape[0], w_oihw.shape[1]
    Cp_out = _round_up(Cout, LANE)

    # Weights: (Cout,Cin,3,3) -> (3,3,Cin,Cout) -> pad channels -> (9*Cp_in, Cp_out) bf16.
    w = jnp.transpose(w_oihw, (2, 3, 1, 0))
    w = jnp.pad(w, ((0, 0), (0, 0), (0, Cp_in - Cin), (0, Cp_out - Cout)))
    w2d = w.reshape(9 * Cp_in, Cp_out).astype(jnp.bfloat16)
    b2d = jnp.pad(bias.astype(jnp.float32), (0, Cp_out - Cout)).reshape(1, Cp_out)

    # im2col in bf16.
    # TODO(synk): do the 3x3 gather in-kernel (9 accumulated shifted matmuls) to cut HBM traffic 9x.
    xp = jnp.pad(x_nhwc, ((0, 0), (1, 1), (1, 1), (0, 0)))
    cols = [xp[:, dy:dy + H, dx:dx + W, :] for dy in range(3) for dx in range(3)]
    patches = jnp.concatenate(cols, axis=-1).reshape(N * H * W, 9 * Cp_in)

    out2d = _conv_matmul(patches, w2d, b2d, apply_relu)
    return out2d.reshape(N, H, W, Cp_out)


def relu_nhwc(x_nhwc):
    N, H, W, Cp = x_nhwc.shape
    M = N * H * W
    x2d = x_nhwc.reshape(M, Cp)
    tm = min(1024, _round_up(M, 8))
    out = pl.pallas_call(
        _relu_kernel,
        out_shape=jax.ShapeDtypeStruct((M, Cp), x2d.dtype),
        grid=(pl.cdiv(M, tm),),
        in_specs=[pl.BlockSpec((tm, Cp), lambda i: (i, 0))],
        out_specs=pl.BlockSpec((tm, Cp), lambda i: (i, 0)),
        compiler_params=pltpu.CompilerParams(
            dimension_semantics=("parallel",),
            vmem_limit_bytes=_VMEM_LIMIT),
    )(x2d)
    return out.reshape(N, H, W, Cp)


def maxpool2x2(x_nhwc):
    """2x2 max pool, stride 2 (PyTorch MaxPool2d(2), floor), NHWC, lane-padded channels."""
    N, H, W, Cp = x_nhwc.shape
    Ho, Wo = H // 2, W // 2
    x = x_nhwc[:, :2 * Ho, :2 * Wo, :]
    # Free row-major reshape: (N,H,W,C) -> (N*Ho, 2, Wo, 2*C).
    xr = x.reshape(N * Ho, 2, Wo, 2 * Cp)
    R = N * Ho
    row_bytes = 2 * Wo * 2 * Cp * xr.dtype.itemsize
    tb_cap = max(8, ((4 << 20) // max(row_bytes, 1)) // 8 * 8)
    tb = min(_round_up(R, 8), tb_cap)

    out = pl.pallas_call(
        functools.partial(_maxpool_kernel, c=Cp),
        out_shape=jax.ShapeDtypeStruct((R, Wo, Cp), xr.dtype),
        grid=(pl.cdiv(R, tb),),
        in_specs=[pl.BlockSpec((tb, 2, Wo, 2 * Cp), lambda i: (i, 0, 0, 0))],
        out_specs=pl.BlockSpec((tb, Wo, Cp), lambda i: (i, 0, 0)),
        compiler_params=pltpu.CompilerParams(
            dimension_semantics=("parallel",),
            vmem_limit_bytes=_VMEM_LIMIT),
    )(xr)
    return out.reshape(N, Ho, Wo, Cp)


# ----------------------------------------------------------------------------
# FeatureExtractorWrapper (JAX/Pallas port)
# ----------------------------------------------------------------------------

_VGG_LAYER_MAP = {
    'conv1_1': 0, 'relu1_1': 1, 'conv1_2': 2, 'relu1_2': 3, 'pool1': 4,
    'conv2_1': 5, 'relu2_1': 6, 'conv2_2': 7, 'relu2_2': 8, 'pool2': 9,
    'conv3_1': 10, 'relu3_1': 11, 'conv3_2': 12, 'relu3_2': 13,
    'conv3_3': 14, 'relu3_3': 15, 'conv3_4': 16, 'relu3_4': 17, 'pool3': 18,
    'conv4_1': 19, 'relu4_1': 20, 'conv4_2': 21, 'relu4_2': 22,
    'conv4_3': 23, 'relu4_3': 24, 'conv4_4': 25, 'relu4_4': 26, 'pool4': 27,
    'conv5_1': 28, 'relu5_1': 29, 'conv5_2': 30, 'relu5_2': 31,
    'conv5_3': 32, 'relu5_3': 33, 'conv5_4': 34, 'relu5_4': 35, 'pool5': 36,
}


class FeatureExtractorWrapper:
    """Pallas-backed port of the PyTorch FeatureExtractorWrapper.

    `base_model` is a list of layer descriptors:
        ('conv', w_oihw, bias) | ('relu',) | ('pool',)
    mirroring a torch.nn.Sequential of Conv2d / ReLU / MaxPool2d layers.
    """

    def __init__(self, base_model, style_layers, content_layers):
        self.base_model = base_model
        self.style_layer_indices = self._get_layer_indices(style_layers)
        self.content_layer_indices = self._get_layer_indices(content_layers)
        style_indices = list(self.style_layer_indices.values())
        content_indices = list(self.content_layer_indices.values())
        all_indices = style_indices + content_indices
        self.max_layer_index = max(all_indices) if all_indices else -1

    def _get_layer_indices(self, layer_names):
        indices_dict = {}
        for name in layer_names:
            if name in _VGG_LAYER_MAP:
                indices_dict[name] = _VGG_LAYER_MAP[name]
            else:
                print(f"Warning: Layer '{name}' not found in VGG feature map.")
        return indices_dict

    def __call__(self, x_nchw):
        N, C, H, W = x_nchw.shape
        # PyTorch NCHW f32 -> internal NHWC bf16 with channels lane-padded to 128.
        current = jnp.transpose(x_nchw, (0, 2, 3, 1)).astype(jnp.bfloat16)
        Cp = _round_up(C, LANE)
        if Cp != C:
            current = jnp.pad(current, ((0, 0), (0, 0), (0, 0), (0, Cp - C)))
        true_c = C

        style_features = {}
        content_features = {}
        style_vals = set(self.style_layer_indices.values())
        content_vals = set(self.content_layer_indices.values())
        captured = style_vals | content_vals

        skip_next_relu = False
        for i, layer in enumerate(self.base_model):
            kind = layer[0]
            if kind == 'relu' and skip_next_relu:
                skip_next_relu = False           # already applied inside the fused conv
            elif kind == 'conv':
                w, b = layer[1], layer[2]
                fuse = (i not in captured
                        and i + 1 < len(self.base_model)
                        and self.base_model[i + 1][0] == 'relu')
                current = conv3x3_bias_act(current, w, b, apply_relu=fuse)
                true_c = w.shape[0]
                skip_next_relu = fuse
            elif kind == 'relu':
                current = relu_nhwc(current)
            elif kind == 'pool':
                current = maxpool2x2(current)
            else:
                raise ValueError(f"unknown layer kind {kind}")

            if i in captured:
                feat = jnp.transpose(
                    current[..., :true_c].astype(jnp.float32), (0, 3, 1, 2))
                for name, idx in self.style_layer_indices.items():
                    if idx == i:
                        style_features[name] = feat
                for name, idx in self.content_layer_indices.items():
                    if idx == i:
                        content_features[name] = feat
            if i >= self.max_layer_index:
                break
        return style_features, content_features


# ----------------------------------------------------------------------------
# Deterministic synthetic base model + demo
# ----------------------------------------------------------------------------

def _make_conv_params(key, cin, cout):
    kw, kb = jax.random.split(key)
    w = jax.random.normal(kw, (cout, cin, 3, 3), jnp.float32) * 0.1
    b = jax.random.normal(kb, (cout,), jnp.float32) * 0.01
    return w, b


def build_small_vgg(key, in_ch=4, c1=8, c2=16):
    """Small VGG-like prefix matching the layer_map indexing (layers 0..9)."""
    keys = jax.random.split(key, 4)
    w11, b11 = _make_conv_params(keys[0], in_ch, c1)  # 0 conv1_1
    w12, b12 = _make_conv_params(keys[1], c1, c1)     # 2 conv1_2
    w21, b21 = _make_conv_params(keys[2], c1, c2)     # 5 conv2_1
    w22, b22 = _make_conv_params(keys[3], c2, c2)     # 7 conv2_2
    return [
        ('conv', w11, b11),  # 0 conv1_1
        ('relu',),           # 1 relu1_1
        ('conv', w12, b12),  # 2 conv1_2
        ('relu',),           # 3 relu1_2
        ('pool',),           # 4 pool1
        ('conv', w21, b21),  # 5 conv2_1
        ('relu',),           # 6 relu2_1
        ('conv', w22, b22),  # 7 conv2_2
        ('relu',),           # 8 relu2_2
        ('pool',),           # 9 pool2
    ]


if __name__ == "__main__":
    key = jax.random.PRNGKey(0)
    k_x, k_model = jax.random.split(key)

    # Small shapes: batch=2, channels=4, spatial=16x16 (NCHW, like PyTorch)
    x = jax.random.normal(k_x, (2, 4, 16, 16), jnp.float32)

    base_model = build_small_vgg(k_model, in_ch=4, c1=8, c2=16)
    extractor = FeatureExtractorWrapper(
        base_model,
        style_layers=['relu1_1', 'relu2_1'],
        content_layers=['relu2_2'],
    )

    style_feats, content_feats = extractor(x)
    jax.block_until_ready((style_feats, content_feats))

    # quick sanity on shapes (NCHW outputs)
    assert style_feats['relu1_1'].shape == (2, 8, 16, 16)
    assert style_feats['relu2_1'].shape == (2, 16, 8, 8)
    assert content_feats['relu2_2'].shape == (2, 16, 8, 8)

    print("KERNEL_OK")
</pallas_src>

<mosaic_0001>
module attributes {stable_mosaic.version = 11 : i64} {
  func.func @_conv_matmul_kernel(%arg0: i32, %arg1: i32, %arg2: i32, %arg3: memref<512x1152xbf16, #tpu.memory_space<vmem>>, %arg4: memref<1152x128xbf16, #tpu.memory_space<vmem>>, %arg5: memref<1x128xf32, #tpu.memory_space<vmem>>, %arg6: memref<512x128xbf16, #tpu.memory_space<vmem>>, %arg7: memref<512x128xf32, #tpu.memory_space<vmem>>) attributes {dimension_semantics = [#tpu.dimension_semantics<parallel>, #tpu.dimension_semantics<parallel>, #tpu.dimension_semantics<arbitrary>], iteration_bounds = array<i64: 1, 1, 1>, scalar_prefetch = 0 : i64, scratch_operands = 1 : i64, tpu.core_type = #tpu.core_type<tc>, window_params = [{transform_indices = @transform_0, window_bounds = array<i64: 512, 1152>}, {transform_indices = @transform_1, window_bounds = array<i64: 1152, 128>}, {transform_indices = @transform_2, window_bounds = array<i64: 1, 128>}, {transform_indices = @transform_3, window_bounds = array<i64: 512, 128>}]} {
    %c0_i32 = arith.constant 0 : i32
    %0 = arith.cmpi eq, %arg2, %c0_i32 : i32
    %1 = arith.extui %0 : i1 to i32
    %c0_i32_0 = arith.constant 0 : i32
    %2 = arith.cmpi ne, %1, %c0_i32_0 : i32
    scf.if %2 {
      %cst_10 = arith.constant 0.000000e+00 : f32
      %12 = vector.broadcast %cst_10 : f32 to vector<512x128xf32>
      %c0_11 = arith.constant 0 : index
      %c0_12 = arith.constant 0 : index
      %13 = vector.load %arg7[%c0_11, %c0_12] : memref<512x128xf32, #tpu.memory_space<vmem>>, vector<512x128xf32>
      tpu.vector_store %arg7[%c0_11, %c0_12], %12 {strides = array<i32>} : memref<512x128xf32, #tpu.memory_space<vmem>>, vector<512x128xf32>,
    } else {
    }
    %c0 = arith.constant 0 : index
    %c0_1 = arith.constant 0 : index
    %3 = vector.load %arg7[%c0, %c0_1] : memref<512x128xf32, #tpu.memory_space<vmem>>, vector<512x128xf32>
    %c0_2 = arith.constant 0 : index
    %c0_3 = arith.constant 0 : index
    %4 = vector.load %arg3[%c0_2, %c0_3] : memref<512x1152xbf16, #tpu.memory_space<vmem>>, vector<512x1152xbf16>
    %c0_4 = arith.constant 0 : index
    %c0_5 = arith.constant 0 : index
    %5 = vector.load %arg4[%c0_4, %c0_5] : memref<1152x128xbf16, #tpu.memory_space<vmem>>, vector<1152x128xbf16>
    %cst = arith.constant dense<0.000000e+00> : vector<512x128xf32>
    %6 = tpu.matmul %4, %5, %cst {dimension_numbers = #tpu.dot_dimension_numbers<[1], [0], [0], [1], [0, 0, 1, 1], [], []>} : vector<512x1152xbf16>, vector<1152x128xbf16>, vector<512x128xf32> -> vector<512x128xf32>
    %7 = arith.addf %3, %6 : vector<512x128xf32>
    %c0_6 = arith.constant 0 : index
    %c0_7 = arith.constant 0 : index
    %8 = vector.load %arg7[%c0_6, %c0_7] : memref<512x128xf32, #tpu.memory_space<vmem>>, vector<512x128xf32>
    tpu.vector_store %arg7[%c0_6, %c0_7], %7 {strides = array<i32>} : memref<512x128xf32, #tpu.memory_space<vmem>>, vector<512x128xf32>,
    %c0_i32_8 = arith.constant 0 : i32
    %9 = arith.cmpi eq, %arg2, %c0_i32_8 : i32
    %10 = arith.extui %9 : i1 to i32
    %c0_i32_9 = arith.constant 0 : i32
    %11 = arith.cmpi ne, %10, %c0_i32_9 : i32
    scf.if %11 {
      %c0_10 = arith.constant 0 : index
      %c0_11 = arith.constant 0 : index
      %12 = vector.load %arg7[%c0_10, %c0_11] : memref<512x128xf32, #tpu.memory_space<vmem>>, vector<512x128xf32>
      %c0_12 = arith.constant 0 : index
      %c0_13 = arith.constant 0 : index
      %13 = vector.load %arg5[%c0_12, %c0_13] : memref<1x128xf32, #tpu.memory_space<vmem>>, vector<1x128xf32>
      %14 = vector.broadcast %13 : vector<1x128xf32> to vector<512x128xf32>
      %15 = arith.addf %12, %14 : vector<512x128xf32>
      %cst_14 = arith.constant 0.000000e+00 : f32
      %16 = vector.broadcast %cst_14 : f32 to vector<512x128xf32>
      %17 = arith.maximumf %15, %16 : vector<512x128xf32>
      %18 = arith.truncf %17 : vector<512x128xf32> to vector<512x128xbf16>
      %c0_15 = arith.constant 0 : index
      %c0_16 = arith.constant 0 : index
      %19 = vector.load %arg6[%c0_15, %c0_16] : memref<512x128xbf16, #tpu.memory_space<vmem>>, vector<512x128xbf16>
      tpu.vector_store %arg6[%c0_15, %c0_16], %18 {strides = array<i32>} : memref<512x128xbf16, #tpu.memory_space<vmem>>, vector<512x128xbf16>,
    } else {
    }
    return
  }
  func.func @transform_0(%arg0: i32, %arg1: i32, %arg2: i32) -> (i32, i32) {
    %c0_i32 = arith.constant 0 : i32
    return %arg0, %arg2 : i32, i32
  }
  func.func @transform_1(%arg0: i32, %arg1: i32, %arg2: i32) -> (i32, i32) {
    %c0_i32 = arith.constant 0 : i32
    return %arg2, %arg1 : i32, i32
  }
  func.func @transform_2(%arg0: i32, %arg1: i32, %arg2: i32) -> (i32, i32) {
    %c0_i32 = arith.constant 0 : i32
    %c0_i32_0 = arith.constant 0 : i32
    return %c0_i32, %arg1 : i32, i32
  }
  func.func @transform_3(%arg0: i32, %arg1: i32, %arg2: i32) -> (i32, i32) {
    %c0_i32 = arith.constant 0 : i32
    return %arg0, %arg1 : i32, i32
  }
}

</mosaic_0001>

<bundles_post_ra>
// kernel: tpu_custom_call.1
= control target key start
LH: loop header
LB: loop body
LE: loop exit
PB: predicated region body
PF: predicated region fallthrough
CT: control target
= control target key end

     0   :  { %8 = vsyncpa [#allocation4], 0  ;;  %s7062_s0 = inlined_call_operand.hbm [shape: bf16[512,1152], index: 0, kind: input, shape index: {}]   ;;  %s7063_s1 = inlined_call_operand.hbm [shape: bf16[1152,128], index: 1, kind: input, shape index: {}]   ;;  %s7064_s2 = inlined_call_operand.hbm [shape: f32[1,128], index: 2, kind: input, shape index: {}]   ;;  %s7065_s3 = inlined_call_operand.hbm [shape: bf16[512,128], index: 3, kind: output, shape index: {}]  }
   0x1   :  { %9 = vsyncpa [#allocation7], 0 }
   0x2   :  { %10 = vsyncpa [#allocation5], 0  ;;  %s6411_s12 = smov [#allocation6]   ;;  %s6317_s16 = scalar_lea.hbm %s7063_s1, 9216 }
   0x3   :  { %s28_s13 = sshll.u32 %s6411_s12, 4  ;;  %p6318_p0 = scmp.ne.s32.totalorder %s7063_s1, %s6317_s16  ;;  %s29_s13 = int_to_ptr.vmem [resolvable:$true] %s28_s13 }
   0x4   :  { %p6321_p1 = scmp.lt.u32.totalorder %s6317_s16, %s7063_s1 }
   0x6   :  { %p6323_p2 = pnand %p6321_p1, %p6318_p0 }
   0x8   :  { %6326 = shalt.err (!%p6323_p2)
}
   0x9   :  { %s6327_s21 = scalar_lea.vmem %s29_s13, 9216  ;;  %p6332_p4 = scmp.lt.s32.totalorder %s29_s13, %s29_s13 }
   0xa   :  { %p6328_p3 = scmp.ne.s32.totalorder %s29_s13, %s6327_s21  ;;  %p6333_p5 = scmp.lt.s32.totalorder %s6327_s21, %s6327_s21 }
   0xc   :  { %p6334_p6 = por %p6333_p5, %p6332_p4 }
   0xe   :  { %p6335_p7 = pnand %p6334_p6, %p6328_p3 }
  0x10   :  { %6338 = shalt.err (!%p6335_p7)
}
  0x11   :  { %s6412_s22 = smov 64   ;;  %s6413_s23 = smov 4  }
  0x12   :  { %34 = dma.hbm_to_vmem [thread:$0]  %s7063_s1, 9216, %s29_s13, [#allocation7], %s6412_s22, %s6412_s22, %s6413_s23  }
  0x13   :  { %s6414_s26 = smov [#allocation3]   ;;  %s6339_s30 = scalar_lea.hbm %s7062_s0, 36864 }
  0x14   :  { %s16_s27 = sshll.u32 %s6414_s26, 4  ;;  %p6340_p8 = scmp.ne.s32.totalorder %s7062_s0, %s6339_s30  ;;  %s17_s27 = int_to_ptr.vmem [resolvable:$true] %s16_s27 }
  0x15   :  { %p6343_p9 = scmp.lt.u32.totalorder %s6339_s30, %s7062_s0 }
  0x17   :  { %p6345_p10 = pnand %p6343_p9, %p6340_p8 }
  0x19   :  { %6348 = shalt.err (!%p6345_p10)
}
  0x1a   :  { %s6349_s8 = scalar_lea.vmem %s17_s27, 36864  ;;  %p6354_p12 = scmp.lt.s32.totalorder %s17_s27, %s17_s27 }
  0x1b   :  { %p6350_p11 = scmp.ne.s32.totalorder %s17_s27, %s6349_s8  ;;  %p6355_p13 = scmp.lt.s32.totalorder %s6349_s8, %s6349_s8 }
  0x1d   :  { %p6356_p0 = por %p6355_p13, %p6354_p12 }
  0x1f   :  { %p6357_p1 = pnand %p6356_p0, %p6350_p11 }
  0x21   :  { %6360 = shalt.err (!%p6357_p1)
}
  0x22   :  { %s6415_s1 = smov 576   ;;  %s6416_s9 = smov 36  }
  0x23   :  { %22 = dma.hbm_to_vmem [thread:$0]  %s7062_s0, 36864, %s17_s27, [#allocation4], %s6415_s1, %s6415_s1, %s6416_s9  }
  0x24   :  { %s6417_s12 = smov [#allocation8]   ;;  %s6361_s16 = scalar_lea.hbm %s7064_s2, 16 }
  0x25   :  { %s41_s13 = sshll.u32 %s6417_s12, 4  ;;  %p6362_p2 = scmp.ne.s32.totalorder %s7064_s2, %s6361_s16  ;;  %s42_s13 = int_to_ptr.vmem [resolvable:$true] %s41_s13 }
  0x26   :  { %p6365_p3 = scmp.lt.u32.totalorder %s6361_s16, %s7064_s2 }
  0x28   :  { %p6367_p4 = pnand %p6365_p3, %p6362_p2 }
  0x2a   :  { %6370 = shalt.err (!%p6367_p4)
}
  0x2b   :  { %s6371_s21 = scalar_lea.vmem %s42_s13, 16  ;;  %s6375_s0 = scalar_lea.vmem %s42_s13, 32 }
  0x2c   :  { %p6372_p5 = scmp.ne.s32.totalorder %s42_s13, %s6371_s21  ;;  %p6376_p6 = scmp.lt.s32.totalorder %s42_s13, %s42_s13 }
  0x2d   :  { %p6377_p7 = scmp.lt.s32.totalorder %s6375_s0, %s6371_s21 }
  0x2f   :  { %p6378_p8 = por %p6377_p7, %p6376_p6 }
  0x31   :  { %p6379_p9 = pnand %p6378_p8, %p6372_p5 }
  0x33   :  { %6382 = shalt.err (!%p6379_p9)
}
  0x34   :  { %44 = dma.hbm_to_vmem [thread:$0]  %s7064_s2, 16, %s42_s13, [#allocation7]  }
  0x35   :  { %6405 = dma.done.wait [#allocation4], 36864  }
  0x36   :  { %6406 = vsyncadd [#allocation4], 4294930432 }
  0x37   :  { %6407 = dma.done.wait [#allocation7], 9232  }
  0x38   :  { %6408 = vsyncadd [#allocation7], 4294958064  ;;  %v6418_v0 = vmov 0   ;;  %v5829_v1 = vld [vmem:[#allocation6] sm:$0xff]   ;;  %v5831_v3 = vld [vmem:[#allocation6 + $0x8] sm:$0xff]   ;;  %s6419_s2 = smov [#allocation9]  }
  0x39   :  { %2555 = vmatprep.subr.bf16.mxu1 %v6418_v0  ;;  %2844 = vmatprep.subr.bf16.mxu0 %v6418_v0  ;;  %v6481_v2 = vld [vmem:[#allocation6 + $0x80] sm:$0xff]   ;;  %v6485_v4 = vld [vmem:[#allocation6 + $0x88] sm:$0xff]   ;;  %v5833_v5 = vld [vmem:[#allocation6 + $0x10] sm:$0xff]   ;;  %s4655_s26 = sshll.u32 %s6419_s2, 4  ;;  %s4656_s26 = int_to_ptr.vmem [resolvable:$true] %s4655_s26 }
  0x3a   :  { %2556 = vmatpush1.bf16.msra.mxu1 %v5829_v1  ;;  %2845 = vmatpush1.bf16.msra.mxu0 %v6481_v2  ;;  %v6490_v6 = vld [vmem:[#allocation6 + $0x90] sm:$0xff]   ;;  %v5835_v7 = vld [vmem:[#allocation6 + $0x18] sm:$0xff]   ;;  %v5837_v9 = vld [vmem:[#allocation6 + $0x20] sm:$0xff]   ;;  %s6383_s27 = scalar_lea.vmem %s4656_s26, 4096  ;;  %p6388_p11 = scmp.lt.s32.totalorder %s4656_s26, %s4656_s26 }
  0x3b   :  { %2557 = vmatprep.subr.bf16.mxu1 %v6418_v0  ;;  %2846 = vmatprep.subr.bf16.mxu0 %v6418_v0  ;;  %v6495_v8 = vld [vmem:[#allocation6 + $0x98] sm:$0xff]   ;;  %v6500_v10 = vld [vmem:[#allocation6 + $0xa0] sm:$0xff]   ;;  %v5839_v11 = vld [vmem:[#allocation6 + $0x28] sm:$0xff]   ;;  %p6384_p10 = scmp.ne.s32.totalorder %s4656_s26, %s6383_s27  ;;  %p6389_p12 = scmp.lt.s32.totalorder %s6383_s27, %s6383_s27 }
  0x3c   :  { %v6505_v12 = vld [vmem:[#allocation6 + $0xa8] sm:$0xff]   ;;  %v5841_v13 = vld [vmem:[#allocation6 + $0x30] sm:$0xff]   ;;  %v5843_v15 = vld [vmem:[#allocation6 + $0x38] sm:$0xff]  }
  0x3d   :  { %v6510_v14 = vld [vmem:[#allocation6 + $0xb0] sm:$0xff]   ;;  %v6515_v16 = vld [vmem:[#allocation6 + $0xb8] sm:$0xff]   ;;  %v5845_v17 = vld [vmem:[#allocation6 + $0x40] sm:$0xff]   ;;  %p6390_p13 = por %p6389_p12, %p6388_p11 }
  0x3e   :  { %2558 = vmatpush1.bf16.msra.mxu1 %v5831_v3  ;;  %2847 = vmatpush1.bf16.msra.mxu0 %v6485_v4  ;;  %v6520_v18 = vld [vmem:[#allocation6 + $0xc0] sm:$0xff]   ;;  %v5847_v20 = vld [vmem:[#allocation6 + $0x48] sm:$0xff]   ;;  %v5849_v23 = vld [vmem:[#allocation6 + $0x50] sm:$0xff]  }
  0x3f   :  { %2559 = vmatprep.subr.bf16.mxu1 %v6418_v0  ;;  %2848 = vmatprep.subr.bf16.mxu0 %v6418_v0  ;;  %v5863_v19 = vld [vmem:[#allocation3 + $0x4] ss:$36 sps:$4 sm:$0xff]   ;;  %v5866_v21 = vld [vmem:[#allocation3 + $0xc] ss:$36 sps:$4 sm:$0xff]   ;;  %v5851_v25 = vld [vmem:[#allocation6 + $0x58] sm:$0xff]   ;;  %p6391_p0 = pnand %p6390_p13, %p6384_p10 }
  0x40   :  { %v6525_v22 = vld [vmem:[#allocation6 + $0xc8] sm:$0xff]   ;;  %2587 = vmatprep.mubr.bf16.mxu1 %v5863_v19  ;;  %2876 = vmatprep.mubr.bf16.mxu0 %v5866_v21  ;;  %v6530_v24 = vld [vmem:[#allocation6 + $0xd0] sm:$0xff]   ;;  %v6535_v26 = vld [vmem:[#allocation6 + $0xd8] sm:$0xff]  }
  0x41   :  { %v5853_v27 = vld [vmem:[#allocation6 + $0x60] sm:$0xff]   ;;  %v5855_v29 = vld [vmem:[#allocation6 + $0x68] sm:$0xff]   ;;  %v5857_v31 = vld [vmem:[#allocation6 + $0x70] sm:$0xff]  }
  0x42   :  { %2560 = vmatpush1.bf16.msra.mxu1 %v5833_v5  ;;  %2849 = vmatpush1.bf16.msra.mxu0 %v6490_v6  ;;  %v6540_v28 = vld [vmem:[#allocation6 + $0xe0] sm:$0xff]   ;;  %v6545_v30 = vld [vmem:[#allocation6 + $0xe8] sm:$0xff]   ;;  %v6550_v32 = vld [vmem:[#allocation6 + $0xf0] sm:$0xff]  }
  0x43   :  { %2561 = vmatprep.subr.bf16.mxu1 %v6418_v0  ;;  %2850 = vmatprep.subr.bf16.mxu0 %v6418_v0  ;;  %v5859_v33 = vld [vmem:[#allocation6 + $0x78] sm:$0xff]   ;;  %v5861_v35 = vld [vmem:[#allocation3] ss:$36 sps:$4 sm:$0xff]   ;;  %v5864_v36 = vld [vmem:[#allocation3 + $0x8] ss:$36 sps:$4 sm:$0xff]  }
  0x44   :  { %v6555_v34 = vld [vmem:[#allocation6 + $0xf8] sm:$0xff]   ;;  %v5867_v37 = vld [vmem:[#allocation6 + $0x100] sm:$0xff]   ;;  %v5869_v38 = vld [vmem:[#allocation3 + $0x4c] ss:$36 sps:$4 sm:$0xff]  }
  0x45   :  { %v5871_v39 = vld [vmem:[#allocation3 + $0x54] ss:$36 sps:$4 sm:$0xff]   ;;  %v5868_v40 = vld [vmem:[#allocation6 + $0x108] sm:$0xff]   ;;  %v5879_v45 = vld [vmem:[#allocation3 + $0x9c] ss:$36 sps:$4 sm:$0xff]  }
  0x46   :  { %2562 = vmatpush1.bf16.msra.mxu1 %v5835_v7  ;;  %2851 = vmatpush1.bf16.msra.mxu0 %v6495_v8  ;;  %v5873_v41 = vld [vmem:[#allocation3 + $0x48] ss:$36 sps:$4 sm:$0xff]   ;;  %v5874_v42 = vld [vmem:[#allocation3 + $0x50] ss:$36 sps:$4 sm:$0xff]   ;;  %v5876_v46 = vld [vmem:[#allocation6 + $0x118] sm:$0xff]  }
  0x47   :  { %2563 = vmatprep.subr.bf16.mxu1 %v6418_v0  ;;  %2852 = vmatprep.subr.bf16.mxu0 %v6418_v0  ;;  %v5877_v43 = vld [vmem:[#allocation3 + $0x94] ss:$36 sps:$4 sm:$0xff]   ;;  %v5883_v49 = vld [vmem:[#allocation6 + $0x120] sm:$0xff]   ;;  %v5884_v52 = vld [vmem:[#allocation6 + $0x128] sm:$0xff]  }
  0x48   :  { %v5875_v44 = vld [vmem:[#allocation6 + $0x110] sm:$0xff]   ;;  %v5882_v48 = vld [vmem:[#allocation3 + $0x98] ss:$36 sps:$4 sm:$0xff]   ;;  %v5887_v51 = vld [vmem:[#allocation3 + $0xe4] ss:$36 sps:$4 sm:$0xff]  }
  0x49   :  { %v5881_v47 = vld [vmem:[#allocation3 + $0x90] ss:$36 sps:$4 sm:$0xff]   ;;  %v5885_v50 = vld [vmem:[#allocation3 + $0xdc] ss:$36 sps:$4 sm:$0xff]   ;;  %v5893_v55 = vld [vmem:[#allocation3 + $0x124] ss:$36 sps:$4 sm:$0xff]  }
  0x4a   :  { %2564 = vmatpush1.bf16.msra.mxu1 %v5837_v9  ;;  %2853 = vmatpush1.bf16.msra.mxu0 %v6500_v10  ;;  %v5889_v53 = vld [vmem:[#allocation3 + $0xd8] ss:$36 sps:$4 sm:$0xff]   ;;  %v5890_v54 = vld [vmem:[#allocation3 + $0xe0] ss:$36 sps:$4 sm:$0xff]   ;;  %v5891_v56 = vld [vmem:[#allocation6 + $0x130] sm:$0xff]  }
  0x4b   :  { %2565 = vmatprep.subr.bf16.mxu1 %v6418_v0  ;;  %2854 = vmatprep.subr.bf16.mxu0 %v6418_v0  ;;  %v5895_v57 = vld [vmem:[#allocation3 + $0x12c] ss:$36 sps:$4 sm:$0xff]   ;;  %v5892_v58 = vld [vmem:[#allocation6 + $0x138] sm:$0xff]   ;;  %v5897_v59 = vld [vmem:[#allocation3 + $0x120] ss:$36 sps:$4 sm:$0xff]  }
  0x4c   :  { %v5898_v60 = vld [vmem:[#allocation3 + $0x128] ss:$36 sps:$4 sm:$0xff]   ;;  %v5899_v61 = vld [vmem:[#allocation6 + $0x140] sm:$0xff]   ;;  %v5903_v63 = vld [vmem:[#allocation3 + $0x174] ss:$36 sps:$4 sm:$0xff]  }
  0x4d   :  { %v5901_v62 = vld [vmem:[#allocation3 + $0x16c] ss:$36 sps:$4 sm:$0xff]   ;;  %v5908_v7 = vld [vmem:[#allocation6 + $0x158] sm:$0xff]  }
  0x4e   :  { %2566 = vmatpush1.bf16.msra.mxu1 %v5839_v11  ;;  %2855 = vmatpush1.bf16.msra.mxu0 %v6505_v12  ;;  %v5900_v1 = vld [vmem:[#allocation6 + $0x148] sm:$0xff]   ;;  %v5906_v3 = vld [vmem:[#allocation3 + $0x170] ss:$36 sps:$4 sm:$0xff]   ;;  %v5914_v9 = vld [vmem:[#allocation3 + $0x1b8] ss:$36 sps:$4 sm:$0xff]  }
  0x4f   :  { %2567 = vmatprep.subr.bf16.mxu1 %v6418_v0  ;;  %2856 = vmatprep.subr.bf16.mxu0 %v6418_v0  ;;  %v5907_v5 = vld [vmem:[#allocation6 + $0x150] sm:$0xff]   ;;  %v5917_v11 = vld [vmem:[#allocation3 + $0x1fc] ss:$36 sps:$4 sm:$0xff]  }
  0x50   :  { %v5924_v19 = vld [vmem:[#allocation6 + $0x178] sm:$0xff]   ;;  %v5927_v21 = vld [vmem:[#allocation3 + $0x10] ss:$36 sps:$4 sm:$0xff]  }
  0x52   :  { %2568 = vmatpush1.bf16.msra.mxu1 %v5841_v13  ;;  %2857 = vmatpush1.bf16.msra.mxu0 %v6510_v14  ;;  %v5916_v13 = vld [vmem:[#allocation6 + $0x168] sm:$0xff]  }
  0x53   :  { %2569 = vmatprep.subr.bf16.mxu1 %v6418_v0  ;;  %2858 = vmatprep.subr.bf16.mxu0 %v6418_v0 }
  0x56   :  { %2570 = vmatpush1.bf16.msra.mxu1 %v5843_v15  ;;  %2859 = vmatpush1.bf16.msra.mxu0 %v6515_v16  ;;  %v5922_v15 = vld [vmem:[#allocation3 + $0x200] ss:$36 sps:$4 sm:$0xff]  }
  0x57   :  { %2571 = vmatprep.subr.bf16.mxu1 %v6418_v0  ;;  %2860 = vmatprep.subr.bf16.mxu0 %v6418_v0 }
  0x5a   :  { %2572 = vmatpush1.bf16.msra.mxu1 %v5845_v17  ;;  %2861 = vmatpush1.bf16.msra.mxu0 %v6520_v18  ;;  %v5923_v17 = vld [vmem:[#allocation6 + $0x170] sm:$0xff]  }
  0x5b   :  { %2573 = vmatprep.subr.bf16.mxu1 %v6418_v0  ;;  %2862 = vmatprep.subr.bf16.mxu0 %v6418_v0 }
  0x5e   :  { %2574 = vmatpush1.bf16.msra.mxu1 %v5847_v20  ;;  %2863 = vmatpush1.bf16.msra.mxu0 %v6525_v22  ;;  %v5930_v20 = vld [vmem:[#allocation3 + $0x240] ss:$36 sps:$4 sm:$0xff]  }
  0x5f   :  { %2575 = vmatprep.subr.bf16.mxu1 %v6418_v0  ;;  %2864 = vmatprep.subr.bf16.mxu0 %v6418_v0 }
  0x62   :  { %2576 = vmatpush1.bf16.msra.mxu1 %v5849_v23  ;;  %2865 = vmatpush1.bf16.msra.mxu0 %v6530_v24  ;;  %v5931_v23 = vld [vmem:[#allocation6 + $0x180] sm:$0xff]  }
  0x63   :  { %2577 = vmatprep.subr.bf16.mxu1 %v6418_v0  ;;  %2866 = vmatprep.subr.bf16.mxu0 %v6418_v0 }
  0x66   :  { %2578 = vmatpush1.bf16.msra.mxu1 %v5851_v25  ;;  %2867 = vmatpush1.bf16.msra.mxu0 %v6535_v26  ;;  %v5936_v25 = vld [vmem:[#allocation3 + $0x288] ss:$36 sps:$4 sm:$0xff]  }
  0x67   :  { %2579 = vmatprep.subr.bf16.mxu1 %v6418_v0  ;;  %2868 = vmatprep.subr.bf16.mxu0 %v6418_v0 }
  0x6a   :  { %2580 = vmatpush1.bf16.msra.mxu1 %v5853_v27  ;;  %2869 = vmatpush1.bf16.msra.mxu0 %v6540_v28  ;;  %v5937_v27 = vld [vmem:[#allocation3 + $0x58] ss:$36 sps:$4 sm:$0xff]  }
  0x6b   :  { %2581 = vmatprep.subr.bf16.mxu1 %v6418_v0  ;;  %2870 = vmatprep.subr.bf16.mxu0 %v6418_v0 }
  0x6e   :  { %2582 = vmatpush1.bf16.msra.mxu1 %v5855_v29  ;;  %2871 = vmatpush1.bf16.msra.mxu0 %v6545_v30  ;;  %v5940_v29 = vld [vmem:[#allocation3 + $0xa4] ss:$36 sps:$4 sm:$0xff]  }
  0x6f   :  { %2583 = vmatprep.subr.bf16.mxu1 %v6418_v0  ;;  %2872 = vmatprep.subr.bf16.mxu0 %v6418_v0 }
  0x72   :  { %2584 = vmatpush1.bf16.msra.mxu1 %v5857_v31  ;;  %2873 = vmatpush1.bf16.msra.mxu0 %v6550_v32  ;;  %v5942_v31 = vld [vmem:[#allocation3 + $0x2d0] ss:$36 sps:$4 sm:$0xff]  }
  0x73   :  { %2585 = vmatprep.subr.bf16.mxu1 %v6418_v0  ;;  %2874 = vmatprep.subr.bf16.mxu0 %v6418_v0 }
  0x76   :  { %2586 = vmatpush1.bf16.msra.mxu1 %v5859_v33  ;;  %2875 = vmatpush1.bf16.msra.mxu0 %v6555_v34  ;;  %v5943_v33 = vld [vmem:[#allocation3 + $0xa0] ss:$36 sps:$4 sm:$0xff]  }
  0x77   :  { %5468 = vmatprep.subr.bf16.mxu1 %v6418_v0  ;;  %3133 = vmatprep.subr.bf16.mxu0 %v6418_v0 }
  0x79   :  { %2588 = vmatmul.mubr.bf16.vlgmr.msra.gmra.mrb[0].mxu1 %v5861_v35  ;;  %2877 = vmatmul.mubr.bf16.vlgmr.msra.gmra.mrb[0].mxu0 %v5864_v36  ;;  %v5947_v35 = vld [vmem:[#allocation3 + $0xec] ss:$36 sps:$4 sm:$0xff]   ;;  %v5983_v36 = vld [vmem:[#allocation6 + $0x1a0] sm:$0xff]  }
  0x7a   :  { %5484 = vmatpush1.bf16.msra.mxu1 %v6481_v2  ;;  %3134 = vmatpush1.bf16.msra.mxu0 %v5867_v37  ;;  %v5905_v2 = vld [vmem:[#allocation3 + $0x168] ss:$36 sps:$4 sm:$0xff]  }
  0x7b   :  { %2595 = vmatprep.mubr.bf16.mxu1 %v5869_v38  ;;  %3135 = vmatprep.subr.bf16.mxu0 %v6418_v0  ;;  %v5996_v37 = vld [vmem:[#allocation6 + $0x1a8] sm:$0xff]   ;;  %v5949_v38 = vld [vmem:[#allocation3 + $0x318] ss:$36 sps:$4 sm:$0xff]  }
  0x7c   :  { %2884 = vmatprep.mubr.bf16.mxu0 %v5871_v39  ;;  %5469 = vmatprep.subr.bf16.mxu1 %v6418_v0  ;;  %v5950_v39 = vld [vmem:[#allocation3 + $0xe8] ss:$36 sps:$4 sm:$0xff]  }
  0x7e   :  { %5485 = vmatpush1.bf16.msra.mxu1 %v6485_v4  ;;  %3136 = vmatpush1.bf16.msra.mxu0 %v5868_v40  ;;  %v5909_v4 = vld [vmem:[#allocation3 + $0x1b4] ss:$36 sps:$4 sm:$0xff]   ;;  %v5951_v40 = vld [vmem:[#allocation3 + $0x364] ss:$36 sps:$4 sm:$0xff]  }
  0x7f   :  { %5470 = vmatprep.subr.bf16.mxu1 %v6418_v0  ;;  %3137 = vmatprep.subr.bf16.mxu0 %v6418_v0 }
  0x81   :  { %2596 = vmatmul.mubr.bf16.gmra.mrb[4].mxu1 %v5873_v41  ;;  %2885 = vmatmul.mubr.bf16.gmra.mrb[4].mxu0 %v5874_v42  ;;  %v5953_v41 = vld [vmem:[#allocation3 + $0x134] ss:$36 sps:$4 sm:$0xff]  }
  0x82   :  { %2603 = vmatprep.mubr.bf16.mxu1 %v5877_v43  ;;  %3138 = vmatpush1.bf16.msra.mxu0 %v5875_v44  ;;  %v6009_v42 = vld [vmem:[#allocation6 + $0x1b0] sm:$0xff]   ;;  %v6022_v43 = vld [vmem:[#allocation6 + $0x1b8] sm:$0xff]   ;;  %v5955_v44 = vld [vmem:[#allocation3 + $0x360] ss:$36 sps:$4 sm:$0xff]  }
  0x83   :  { %2892 = vmatprep.mubr.bf16.mxu0 %v5879_v45  ;;  %3139 = vmatprep.subr.bf16.mxu0 %v6418_v0  ;;  %v5956_v45 = vld [vmem:[#allocation3 + $0x130] ss:$36 sps:$4 sm:$0xff]  }
  0x84   :  { %5486 = vmatpush1.bf16.msra.mxu1 %v6490_v6  ;;  %v5911_v6 = vld [vmem:[#allocation3 + $0x1bc] ss:$36 sps:$4 sm:$0xff]  }
  0x85   :  { %5471 = vmatprep.subr.bf16.mxu1 %v6418_v0 }
  0x86   :  { %3140 = vmatpush1.bf16.msra.mxu0 %v5876_v46  ;;  %v5958_v46 = vld [vmem:[#allocation3 + $0x3ac] ss:$36 sps:$4 sm:$0xff]  }
  0x87   :  { %3141 = vmatprep.subr.bf16.mxu0 %v6418_v0 }
  0x88   :  { %5487 = vmatpush1.bf16.msra.mxu1 %v6495_v8  ;;  %v5913_v8 = vld [vmem:[#allocation3 + $0x1b0] ss:$36 sps:$4 sm:$0xff]  }
  0x89   :  { %2604 = vmatmul.mubr.bf16.gmra.mrb[8].mxu1 %v5881_v47  ;;  %5472 = vmatprep.subr.bf16.mxu1 %v6418_v0  ;;  %v5960_v47 = vld [vmem:[#allocation3 + $0x17c] ss:$36 sps:$4 sm:$0xff]  }
  0x8a   :  { %2893 = vmatmul.mubr.bf16.gmra.mrb[8].mxu0 %v5882_v48  ;;  %2611 = vmatprep.mubr.bf16.mxu1 %v5885_v50  ;;  %v6035_v48 = vld [vmem:[#allocation6 + $0x1c0] sm:$0xff]   ;;  %v5962_v50 = vld [vmem:[#allocation3 + $0x3a8] ss:$36 sps:$4 sm:$0xff]  }
  0x8b   :  { %3142 = vmatpush1.bf16.msra.mxu0 %v5883_v49  ;;  %2900 = vmatprep.mubr.bf16.mxu0 %v5887_v51  ;;  %v6048_v49 = vld [vmem:[#allocation6 + $0x1c8] sm:$0xff]   ;;  %v5963_v51 = vld [vmem:[#allocation3 + $0x178] ss:$36 sps:$4 sm:$0xff]  }
  0x8c   :  { %3143 = vmatprep.subr.bf16.mxu0 %v6418_v0  ;;  %5488 = vmatpush1.bf16.msra.mxu1 %v6500_v10  ;;  %v5915_v10 = vld [vmem:[#allocation6 + $0x160] sm:$0xff]  }
  0x8d   :  { %5473 = vmatprep.subr.bf16.mxu1 %v6418_v0 }
  0x8f   :  { %3144 = vmatpush1.bf16.msra.mxu0 %v5884_v52  ;;  %v5964_v52 = vld [vmem:[#allocation3 + $0x3f4] ss:$36 sps:$4 sm:$0xff]  }
  0x90   :  { %3145 = vmatprep.subr.bf16.mxu0 %v6418_v0  ;;  %5489 = vmatpush1.bf16.msra.mxu1 %v6505_v12  ;;  %v5919_v12 = vld [vmem:[#allocation3 + $0x204] ss:$36 sps:$4 sm:$0xff]  }
  0x91   :  { %2612 = vmatmul.mubr.bf16.gmra.mrb[12].mxu1 %v5889_v53  ;;  %5474 = vmatprep.subr.bf16.mxu1 %v6418_v0  ;;  %v5966_v53 = vld [vmem:[#allocation3 + $0x1c4] ss:$36 sps:$4 sm:$0xff]  }
  0x92   :  { %2901 = vmatmul.mubr.bf16.gmra.mrb[12].mxu0 %v5890_v54  ;;  %2619 = vmatprep.mubr.bf16.mxu1 %v5893_v55  ;;  %v6061_v54 = vld [vmem:[#allocation6 + $0x1d0] sm:$0xff]  }
  0x93   :  { %3146 = vmatpush1.bf16.msra.mxu0 %v5891_v56  ;;  %2908 = vmatprep.mubr.bf16.mxu0 %v5895_v57  ;;  %v5968_v55 = vld [vmem:[#allocation3 + $0x3f0] ss:$36 sps:$4 sm:$0xff]   ;;  %v5969_v56 = vld [vmem:[#allocation3 + $0x1c0] ss:$36 sps:$4 sm:$0xff]  }
  0x94   :  { %3147 = vmatprep.subr.bf16.mxu0 %v6418_v0  ;;  %5490 = vmatpush1.bf16.msra.mxu1 %v6510_v14  ;;  %v5921_v14 = vld [vmem:[#allocation3 + $0x1f8] ss:$36 sps:$4 sm:$0xff]  }
  0x95   :  { %5475 = vmatprep.subr.bf16.mxu1 %v6418_v0  ;;  %v5971_v57 = vld [vmem:[#allocation3 + $0x43c] ss:$36 sps:$4 sm:$0xff]  }
  0x97   :  { %3148 = vmatpush1.bf16.msra.mxu0 %v5892_v58  ;;  %v5973_v58 = vld [vmem:[#allocation3 + $0x20c] ss:$36 sps:$4 sm:$0xff]  }
  0x98   :  { %3149 = vmatprep.subr.bf16.mxu0 %v6418_v0  ;;  %5491 = vmatpush1.bf16.msra.mxu1 %v6515_v16  ;;  %v5925_v16 = vld [vmem:[#allocation3 + $0x244] ss:$36 sps:$4 sm:$0xff]  }
  0x99   :  { %2620 = vmatmul.mubr.bf16.gmra.mrb[16].mxu1 %v5897_v59  ;;  %5476 = vmatprep.subr.bf16.mxu1 %v6418_v0  ;;  %v6074_v59 = vld [vmem:[#allocation6 + $0x1d8] sm:$0xff]  }
  0x9a   :  { %2909 = vmatmul.mubr.bf16.gmra.mrb[16].mxu0 %v5898_v60  ;;  %2627 = vmatprep.mubr.bf16.mxu1 %v5901_v62  ;;  %v5975_v60 = vld [vmem:[#allocation3 + $0x438] ss:$36 sps:$4 sm:$0xff]   ;;  %v5977_v62 = vld [vmem:[#allocation3 + $0x484] ss:$36 sps:$4 sm:$0xff]  }
  0x9b   :  { %3150 = vmatpush1.bf16.msra.mxu0 %v5899_v61  ;;  %2916 = vmatprep.mubr.bf16.mxu0 %v5903_v63  ;;  %v5976_v61 = vld [vmem:[#allocation3 + $0x208] ss:$36 sps:$4 sm:$0xff]   ;;  %v5979_v63 = vld [vmem:[#allocation3 + $0x254] ss:$36 sps:$4 sm:$0xff]  }
  0x9c   :  { %3151 = vmatprep.subr.bf16.mxu0 %v6418_v0  ;;  %5492 = vmatpush1.bf16.msra.mxu1 %v6520_v18  ;;  %v5929_v18 = vld [vmem:[#allocation3 + $0x14] ss:$36 sps:$4 sm:$0xff]  }
  0x9d   :  { %5477 = vmatprep.subr.bf16.mxu1 %v6418_v0 }
  0x9f   :  { %3152 = vmatpush1.bf16.msra.mxu0 %v5900_v1  ;;  %v5981_v1 = vld [vmem:[#allocation3 + $0x480] ss:$36 sps:$4 sm:$0xff]  }
  0xa0   :  { %3153 = vmatprep.subr.bf16.mxu0 %v6418_v0  ;;  %5493 = vmatpush1.bf16.msra.mxu1 %v6525_v22  ;;  %v5932_v22 = vld [vmem:[#allocation3 + $0x28c] ss:$36 sps:$4 sm:$0xff]  }
  0xa1   :  { %2628 = vmatmul.mubr.bf16.gmra.mrb[20].mxu1 %v5905_v2  ;;  %5478 = vmatprep.subr.bf16.mxu1 %v6418_v0  ;;  %v5982_v2 = vld [vmem:[#allocation3 + $0x250] ss:$36 sps:$4 sm:$0xff]  }
  0xa2   :  { %2917 = vmatmul.mubr.bf16.gmra.mrb[20].mxu0 %v5906_v3  ;;  %2635 = vmatprep.mubr.bf16.mxu1 %v5909_v4  ;;  %v5984_v3 = vld [vmem:[#allocation3 + $0x4cc] ss:$36 sps:$4 sm:$0xff]   ;;  %v5986_v4 = vld [vmem:[#allocation3 + $0x29c] ss:$36 sps:$4 sm:$0xff]  }
  0xa3   :  { %3154 = vmatpush1.bf16.msra.mxu0 %v5907_v5  ;;  %2924 = vmatprep.mubr.bf16.mxu0 %v5911_v6  ;;  %v6087_v5 = vld [vmem:[#allocation6 + $0x1e0] sm:$0xff]  }
  0xa4   :  { %3155 = vmatprep.subr.bf16.mxu0 %v6418_v0  ;;  %5494 = vmatpush1.bf16.msra.mxu1 %v6530_v24  ;;  %v5934_v24 = vld [vmem:[#allocation3 + $0x5c] ss:$36 sps:$4 sm:$0xff]  }
  0xa5   :  { %5479 = vmatprep.subr.bf16.mxu1 %v6418_v0  ;;  %v6620_v6 = vld [vmem:[#allocation6 + $0x200] sm:$0xff]  }
  0xa7   :  { %3156 = vmatpush1.bf16.msra.mxu0 %v5908_v7  ;;  %v5988_v7 = vld [vmem:[#allocation3 + $0x4c8] ss:$36 sps:$4 sm:$0xff]  }
  0xa8   :  { %3157 = vmatprep.subr.bf16.mxu0 %v6418_v0  ;;  %5495 = vmatpush1.bf16.msra.mxu1 %v6535_v26  ;;  %v5944_v26 = vld [vmem:[#allocation6 + $0x188] sm:$0xff]  }
  0xa9   :  { %2636 = vmatmul.mubr.bf16.gmra.mrb[24].mxu1 %v5913_v8  ;;  %5480 = vmatprep.subr.bf16.mxu1 %v6418_v0  ;;  %v5989_v8 = vld [vmem:[#allocation3 + $0x298] ss:$36 sps:$4 sm:$0xff]  }
  0xaa   :  { %2925 = vmatmul.mubr.bf16.gmra.mrb[24].mxu0 %v5914_v9  ;;  %2643 = vmatprep.mubr.bf16.mxu1 %v5917_v11  ;;  %v5990_v9 = vld [vmem:[#allocation3 + $0x514] ss:$36 sps:$4 sm:$0xff]  }
  0xab   :  { %3158 = vmatpush1.bf16.msra.mxu0 %v5915_v10  ;;  %2932 = vmatprep.mubr.bf16.mxu0 %v5919_v12  ;;  %v5992_v10 = vld [vmem:[#allocation3 + $0x2e4] ss:$36 sps:$4 sm:$0xff]   ;;  %v5994_v11 = vld [vmem:[#allocation3 + $0x510] ss:$36 sps:$4 sm:$0xff]  }
  0xac   :  { %3159 = vmatprep.subr.bf16.mxu0 %v6418_v0  ;;  %5496 = vmatpush1.bf16.msra.mxu1 %v6540_v28  ;;  %v5938_v28 = vld [vmem:[#allocation3 + $0x2d4] ss:$36 sps:$4 sm:$0xff]   ;;  %v5995_v12 = vld [vmem:[#allocation3 + $0x2e0] ss:$36 sps:$4 sm:$0xff]  }
  0xad   :  { %5481 = vmatprep.subr.bf16.mxu1 %v6418_v0 }
  0xaf   :  { %3160 = vmatpush1.bf16.msra.mxu0 %v5916_v13  ;;  %v5997_v13 = vld [vmem:[#allocation3 + $0x55c] ss:$36 sps:$4 sm:$0xff]  }
  0xb0   :  { %3161 = vmatprep.subr.bf16.mxu0 %v6418_v0  ;;  %5497 = vmatpush1.bf16.msra.mxu1 %v6545_v30  ;;  %v5957_v30 = vld [vmem:[#allocation6 + $0x190] sm:$0xff]  }
  0xb1   :  { %2644 = vmatmul.mubr.bf16.gmra.mrb[28].mxu1 %v5921_v14  ;;  %5482 = vmatprep.subr.bf16.mxu1 %v6418_v0  ;;  %v5999_v14 = vld [vmem:[#allocation3 + $0x32c] ss:$36 sps:$4 sm:$0xff]  }
  0xb2   :  { %2933 = vmatmul.mubr.bf16.gmra.mrb[28].mxu0 %v5922_v15  ;;  %2651 = vmatprep.mubr.bf16.mxu1 %v5925_v16  ;;  %v6101_v15 = vld [vmem:[#allocation6 + $0x1e8] sm:$0xff]   ;;  %v6001_v16 = vld [vmem:[#allocation3 + $0x558] ss:$36 sps:$4 sm:$0xff]  }
  0xb3   :  { %3162 = vmatpush1.bf16.msra.mxu0 %v5923_v17  ;;  %3165 = vmatprep.mubr.bf16.mxu0 %v5929_v18  ;;  %v6002_v17 = vld [vmem:[#allocation3 + $0x328] ss:$36 sps:$4 sm:$0xff]  }
  0xb4   :  { %3163 = vmatprep.subr.bf16.mxu0 %v6418_v0  ;;  %5498 = vmatpush1.bf16.msra.mxu1 %v6550_v32  ;;  %v5970_v32 = vld [vmem:[#allocation6 + $0x198] sm:$0xff]   ;;  %v6003_v18 = vld [vmem:[#allocation3 + $0x5a4] ss:$36 sps:$4 sm:$0xff]  }
  0xb5   :  { %5483 = vmatprep.subr.bf16.mxu1 %v6418_v0 }
  0xb7   :  { %3164 = vmatpush1.bf16.msra.mxu0 %v5924_v19  ;;  %v6005_v19 = vld [vmem:[#allocation3 + $0x374] ss:$36 sps:$4 sm:$0xff]  }
  0xb8   :  { %3422 = vmatprep.subr.bf16.mxu0 %v6418_v0  ;;  %5499 = vmatpush1.bf16.msra.mxu1 %v6555_v34  ;;  %v5945_v34 = vld [vmem:[#allocation3 + $0x31c] ss:$36 sps:$4 sm:$0xff]  }
  0xb9   :  { %2652 = vmatmul.mubr.bf16.gmra.mrb[32].mxu1 %v5930_v20  ;;  %5388 = vmatprep.subr.bf16.mxu1 %v6620_v6  ;;  %v6007_v20 = vld [vmem:[#allocation3 + $0x5a0] ss:$36 sps:$4 sm:$0xff]  }
  0xba   :  { %3166 = vmatmul.mubr.bf16.vlgmr.msra.gmra.mrb[0].mxu0 %v5927_v21  ;;  %2659 = vmatprep.mubr.bf16.mxu1 %v5932_v22  ;;  %v6008_v21 = vld [vmem:[#allocation3 + $0x370] ss:$36 sps:$4 sm:$0xff]  }
  0xbb   :  { %3423 = vmatpush1.bf16.msra.mxu0 %v5931_v23  ;;  %3173 = vmatprep.mubr.bf16.mxu0 %v5934_v24  ;;  %v6010_v22 = vld [vmem:[#allocation3 + $0x5ec] ss:$36 sps:$4 sm:$0xff]   ;;  %v6012_v23 = vld [vmem:[#allocation3 + $0x3bc] ss:$36 sps:$4 sm:$0xff]  }
  0xbc   :  { %3424 = vmatprep.subr.bf16.mxu0 %v6418_v0  ;;  %v6115_v24 = vld [vmem:[#allocation6 + $0x1f0] sm:$0xff]  }
  0xbf   :  { %3425 = vmatpush1.bf16.msra.mxu0 %v5944_v26  ;;  %v6015_v26 = vld [vmem:[#allocation3 + $0x3b8] ss:$36 sps:$4 sm:$0xff]  }
  0xc0   :  { %3426 = vmatprep.subr.bf16.mxu0 %v6418_v0 }
  0xc1   :  { %2660 = vmatmul.mubr.bf16.gmra.mrb[36].mxu1 %v5936_v25  ;;  %v6014_v25 = vld [vmem:[#allocation3 + $0x5e8] ss:$36 sps:$4 sm:$0xff]  }
  0xc2   :  { %3174 = vmatmul.mubr.bf16.gmra.mrb[4].mxu0 %v5937_v27  ;;  %2667 = vmatprep.mubr.bf16.mxu1 %v5938_v28  ;;  %v6016_v27 = vld [vmem:[#allocation3 + $0x634] ss:$36 sps:$4 sm:$0xff]   ;;  %v6018_v28 = vld [vmem:[#allocation3 + $0x404] ss:$36 sps:$4 sm:$0xff]  }
  0xc3   :  { %3181 = vmatprep.mubr.bf16.mxu0 %v5940_v29  ;;  %3427 = vmatpush1.bf16.msra.mxu0 %v5957_v30  ;;  %v6020_v29 = vld [vmem:[#allocation3 + $0x630] ss:$36 sps:$4 sm:$0xff]   ;;  %v6021_v30 = vld [vmem:[#allocation3 + $0x400] ss:$36 sps:$4 sm:$0xff]  }
  0xc4   :  { %3428 = vmatprep.subr.bf16.mxu0 %v6418_v0 }
  0xc7   :  { %3429 = vmatpush1.bf16.msra.mxu0 %v5970_v32  ;;  %v6025_v32 = vld [vmem:[#allocation3 + $0x44c] ss:$36 sps:$4 sm:$0xff]  }
  0xc8   :  { %3430 = vmatprep.subr.bf16.mxu0 %v6418_v0 }
  0xc9   :  { %2668 = vmatmul.mubr.bf16.gmra.mrb[40].mxu1 %v5942_v31  ;;  %v6023_v31 = vld [vmem:[#allocation3 + $0x67c] ss:$36 sps:$4 sm:$0xff]  }
  0xca   :  { %3182 = vmatmul.mubr.bf16.gmra.mrb[8].mxu0 %v5943_v33  ;;  %2675 = vmatprep.mubr.bf16.mxu1 %v5945_v34  ;;  %v6128_v33 = vld [vmem:[#allocation6 + $0x1f8] sm:$0xff]  }
  0xcb   :  { %3189 = vmatprep.mubr.bf16.mxu0 %v5947_v35  ;;  %3431 = vmatpush1.bf16.msra.mxu0 %v5983_v36  ;;  %v6027_v34 = vld [vmem:[#allocation3 + $0x678] ss:$36 sps:$4 sm:$0xff]   ;;  %v6028_v35 = vld [vmem:[#allocation3 + $0x448] ss:$36 sps:$4 sm:$0xff]  }
  0xcc   :  { %3432 = vmatprep.subr.bf16.mxu0 %v6418_v0  ;;  %v6031_v36 = vld [vmem:[#allocation3 + $0x494] ss:$36 sps:$4 sm:$0xff]  }
  0xcf   :  { %3433 = vmatpush1.bf16.msra.mxu0 %v5996_v37  ;;  %v6033_v37 = vld [vmem:[#allocation3 + $0x6c0] ss:$36 sps:$4 sm:$0xff]  }
  0xd0   :  { %3434 = vmatprep.subr.bf16.mxu0 %v6418_v0 }
  0xd1   :  { %2676 = vmatmul.mubr.bf16.gmra.mrb[44].mxu1 %v5949_v38  ;;  %v6034_v38 = vld [vmem:[#allocation3 + $0x490] ss:$36 sps:$4 sm:$0xff]  }
  0xd2   :  { %3190 = vmatmul.mubr.bf16.gmra.mrb[12].mxu0 %v5950_v39  ;;  %2683 = vmatprep.mubr.bf16.mxu1 %v5951_v40  ;;  %v6036_v39 = vld [vmem:[#allocation3 + $0x70c] ss:$36 sps:$4 sm:$0xff]   ;;  %v6038_v40 = vld [vmem:[#allocation3 + $0x4dc] ss:$36 sps:$4 sm:$0xff]  }
  0xd3   :  { %3197 = vmatprep.mubr.bf16.mxu0 %v5953_v41  ;;  %3435 = vmatpush1.bf16.msra.mxu0 %v6009_v42  ;;  %v6040_v41 = vld [vmem:[#allocation3 + $0x708] ss:$36 sps:$4 sm:$0xff]   ;;  %v6041_v42 = vld [vmem:[#allocation3 + $0x4d8] ss:$36 sps:$4 sm:$0xff]  }
  0xd4   :  { %3436 = vmatprep.subr.bf16.mxu0 %v6418_v0 }
  0xd7   :  { %3437 = vmatpush1.bf16.msra.mxu0 %v6022_v43  ;;  %v6042_v43 = vld [vmem:[#allocation3 + $0x754] ss:$36 sps:$4 sm:$0xff]  }
  0xd8   :  { %3438 = vmatprep.subr.bf16.mxu0 %v6418_v0 }
  0xd9   :  { %2684 = vmatmul.mubr.bf16.gmra.mrb[48].mxu1 %v5955_v44  ;;  %v6044_v44 = vld [vmem:[#allocation3 + $0x524] ss:$36 sps:$4 sm:$0xff]  }
  0xda   :  { %3198 = vmatmul.mubr.bf16.gmra.mrb[16].mxu0 %v5956_v45  ;;  %2691 = vmatprep.mubr.bf16.mxu1 %v5958_v46  ;;  %v6046_v45 = vld [vmem:[#allocation3 + $0x750] ss:$36 sps:$4 sm:$0xff]   ;;  %v6047_v46 = vld [vmem:[#allocation3 + $0x520] ss:$36 sps:$4 sm:$0xff]  }
  0xdb   :  { %3205 = vmatprep.mubr.bf16.mxu0 %v5960_v47  ;;  %3439 = vmatpush1.bf16.msra.mxu0 %v6035_v48  ;;  %v6049_v47 = vld [vmem:[#allocation3 + $0x79c] ss:$36 sps:$4 sm:$0xff]   ;;  %v6051_v48 = vld [vmem:[#allocation3 + $0x56c] ss:$36 sps:$4 sm:$0xff]  }
  0xdc   :  { %3440 = vmatprep.subr.bf16.mxu0 %v6418_v0 }
  0xdf   :  { %3441 = vmatpush1.bf16.msra.mxu0 %v6048_v49 }
  0xe0   :  { %3442 = vmatprep.subr.bf16.mxu0 %v6418_v0 }
  0xe1   :  { %2692 = vmatmul.mubr.bf16.gmra.mrb[52].mxu1 %v5962_v50 }
  0xe2   :  { %3206 = vmatmul.mubr.bf16.gmra.mrb[20].mxu0 %v5963_v51  ;;  %2699 = vmatprep.mubr.bf16.mxu1 %v5964_v52  ;;  %v6053_v51 = vld [vmem:[#allocation3 + $0x798] ss:$36 sps:$4 sm:$0xff]  }
  0xe3   :  { %3213 = vmatprep.mubr.bf16.mxu0 %v5966_v53  ;;  %3443 = vmatpush1.bf16.msra.mxu0 %v6061_v54  ;;  %v6054_v53 = vld [vmem:[#allocation3 + $0x568] ss:$36 sps:$4 sm:$0xff]  }
  0xe4   :  { %3444 = vmatprep.subr.bf16.mxu0 %v6418_v0  ;;  %v6055_v54 = vld [vmem:[#allocation3 + $0x7e4] ss:$36 sps:$4 sm:$0xff]  }
  0xe7   :  { %3445 = vmatpush1.bf16.msra.mxu0 %v6074_v59  ;;  %v6059_v59 = vld [vmem:[#allocation3 + $0x7e0] ss:$36 sps:$4 sm:$0xff]  }
  0xe8   :  { %3446 = vmatprep.subr.bf16.mxu0 %v6418_v0 }
  0xe9   :  { %2700 = vmatmul.mubr.bf16.gmra.mrb[56].mxu1 %v5968_v55 }
  0xea   :  { %3214 = vmatmul.mubr.bf16.gmra.mrb[24].mxu0 %v5969_v56  ;;  %2707 = vmatprep.mubr.bf16.mxu1 %v5971_v57  ;;  %v6057_v56 = vld [vmem:[#allocation3 + $0x5b4] ss:$36 sps:$4 sm:$0xff]  }
  0xeb   :  { %3221 = vmatprep.mubr.bf16.mxu0 %v5973_v58  ;;  %3447 = vmatpush1.bf16.msra.mxu0 %v6087_v5 }
  0xec   :  { %3448 = vmatprep.subr.bf16.mxu0 %v6418_v0 }
  0xef   :  { %3449 = vmatpush1.bf16.msra.mxu0 %v6101_v15  ;;  %v6073_v15 = vld [vmem:[#allocation3 + $0x640] ss:$36 sps:$4 sm:$0xff]  }
  0xf0   :  { %3450 = vmatprep.subr.bf16.mxu0 %v6418_v0 }
  0xf1   :  { %2708 = vmatmul.mubr.bf16.gmra.mrb[60].mxu1 %v5975_v60 }
  0xf2   :  { %3222 = vmatmul.mubr.bf16.gmra.mrb[28].mxu0 %v5976_v61  ;;  %2715 = vmatprep.mubr.bf16.mxu1 %v5977_v62  ;;  %v6060_v61 = vld [vmem:[#allocation3 + $0x5b0] ss:$36 sps:$4 sm:$0xff]  }
  0xf3   :  { %3229 = vmatprep.mubr.bf16.mxu0 %v5979_v63  ;;  %3451 = vmatpush1.bf16.msra.mxu0 %v6115_v24  ;;  %v6062_v62 = vld [vmem:[#allocation3 + $0x82c] ss:$36 sps:$4 sm:$0xff]  }
  0xf4   :  { %3452 = vmatprep.subr.bf16.mxu0 %v6418_v0  ;;  %v6029_v0 = vld [vmem:[#allocation3 + $0x6c4] ss:$36 sps:$4 sm:$0xff]   ;;  %v6083_v24 = vld [vmem:[#allocation3 + $0x24c] ss:$36 sps:$4 sm:$0xff]  }
  0xf7   :  { %3453 = vmatpush1.bf16.msra.mxu0 %v6128_v33  ;;  %v6089_v33 = vld [vmem:[#allocation3 + $0x294] ss:$36 sps:$4 sm:$0xff]  }
  0xf9   :  { %2716 = vmatmul.mubr.bf16.gmra.mrb[64].mxu1 %v5981_v1  ;;  %v6064_v1 = vld [vmem:[#allocation3 + $0x5fc] ss:$36 sps:$4 sm:$0xff]  }
  0xfa   :  { %3230 = vmatmul.mubr.bf16.gmra.mrb[32].mxu0 %v5982_v2  ;;  %2723 = vmatprep.mubr.bf16.mxu1 %v5984_v3 }
  0xfb   :  { %3237 = vmatprep.mubr.bf16.mxu0 %v5986_v4  ;;  %v6066_v4 = vld [vmem:[#allocation3 + $0x828] ss:$36 sps:$4 sm:$0xff]  }
 0x101   :  { %2724 = vmatmul.mubr.bf16.gmra.mrb[68].mxu1 %v5988_v7  ;;  %v6067_v7 = vld [vmem:[#allocation3 + $0x5f8] ss:$36 sps:$4 sm:$0xff]  }
 0x102   :  { %3238 = vmatmul.mubr.bf16.gmra.mrb[36].mxu0 %v5989_v8  ;;  %2731 = vmatprep.mubr.bf16.mxu1 %v5990_v9  ;;  %v6068_v8 = vld [vmem:[#allocation3 + $0x874] ss:$36 sps:$4 sm:$0xff]  }
 0x103   :  { %3245 = vmatprep.mubr.bf16.mxu0 %v5992_v10  ;;  %v6070_v10 = vld [vmem:[#allocation3 + $0x644] ss:$36 sps:$4 sm:$0xff]  }
 0x109   :  { %2732 = vmatmul.mubr.bf16.gmra.mrb[72].mxu1 %v5994_v11 }
 0x10a   :  { %3246 = vmatmul.mubr.bf16.gmra.mrb[40].mxu0 %v5995_v12  ;;  %2739 = vmatprep.mubr.bf16.mxu1 %v5997_v13  ;;  %v6072_v13 = vld [vmem:[#allocation3 + $0x870] ss:$36 sps:$4 sm:$0xff]  }
 0x10b   :  { %3253 = vmatprep.mubr.bf16.mxu0 %v5999_v14 }
 0x111   :  { %2740 = vmatmul.mubr.bf16.gmra.mrb[76].mxu1 %v6001_v16  ;;  %v6075_v16 = vld [vmem:[#allocation3 + $0x8bc] ss:$36 sps:$4 sm:$0xff]  }
 0x112   :  { %3254 = vmatmul.mubr.bf16.gmra.mrb[44].mxu0 %v6002_v17  ;;  %2747 = vmatprep.mubr.bf16.mxu1 %v6003_v18  ;;  %v6077_v18 = vld [vmem:[#allocation3 + $0x68c] ss:$36 sps:$4 sm:$0xff]  }
 0x113   :  { %3261 = vmatprep.mubr.bf16.mxu0 %v6005_v19 }
 0x119   :  { %2748 = vmatmul.mubr.bf16.gmra.mrb[80].mxu1 %v6007_v20 }
 0x11a   :  { %3262 = vmatmul.mubr.bf16.gmra.mrb[48].mxu0 %v6008_v21  ;;  %2755 = vmatprep.mubr.bf16.mxu1 %v6010_v22  ;;  %v6079_v21 = vld [vmem:[#allocation3 + $0x8b8] ss:$36 sps:$4 sm:$0xff]  }
 0x11b   :  { %3269 = vmatprep.mubr.bf16.mxu0 %v6012_v23  ;;  %v6080_v23 = vld [vmem:[#allocation3 + $0x688] ss:$36 sps:$4 sm:$0xff]  }
 0x121   :  { %2756 = vmatmul.mubr.bf16.gmra.mrb[84].mxu1 %v6014_v25 }
 0x122   :  { %3270 = vmatmul.mubr.bf16.gmra.mrb[52].mxu0 %v6015_v26  ;;  %2763 = vmatprep.mubr.bf16.mxu1 %v6016_v27  ;;  %v6084_v26 = vld [vmem:[#allocation3 + $0x6d4] ss:$36 sps:$4 sm:$0xff]  }
 0x123   :  { %3277 = vmatprep.mubr.bf16.mxu0 %v6018_v28 }
 0x129   :  { %2764 = vmatmul.mubr.bf16.gmra.mrb[88].mxu1 %v6020_v29  ;;  %v6081_v29 = vld [vmem:[#allocation3 + $0x248] ss:$36 sps:$4 sm:$0xff]  }
 0x12a   :  { %3278 = vmatmul.mubr.bf16.gmra.mrb[56].mxu0 %v6021_v30  ;;  %2771 = vmatprep.mubr.bf16.mxu1 %v6023_v31  ;;  %v6086_v31 = vld [vmem:[#allocation3 + $0x6d0] ss:$36 sps:$4 sm:$0xff]  }
 0x12b   :  { %3285 = vmatprep.mubr.bf16.mxu0 %v6025_v32 }
 0x131   :  { %2772 = vmatmul.mubr.bf16.gmra.mrb[92].mxu1 %v6027_v34  ;;  %v6091_v34 = vld [vmem:[#allocation3 + $0x71c] ss:$36 sps:$4 sm:$0xff]  }
 0x132   :  { %3286 = vmatmul.mubr.bf16.gmra.mrb[60].mxu0 %v6028_v35  ;;  %2779 = vmatprep.mubr.bf16.mxu1 %v6029_v0  ;;  %v6108_v35 = vld [vmem:[#allocation6 + $0x208] sm:$0xff]   ;;  %v6129_v0 = vld [vmem:[#allocation6 + $0x210] sm:$0xff]  }
 0x133   :  { %3293 = vmatprep.mubr.bf16.mxu0 %v6031_v36 }
 0x139   :  { %2780 = vmatmul.mubr.bf16.gmra.mrb[96].mxu1 %v6033_v37 }
 0x13a   :  { %3294 = vmatmul.mubr.bf16.gmra.mrb[64].mxu0 %v6034_v38  ;;  %2787 = vmatprep.mubr.bf16.mxu1 %v6036_v39  ;;  %v6093_v38 = vld [vmem:[#allocation3 + $0x290] ss:$36 sps:$4 sm:$0xff]  }
 0x13b   :  { %3301 = vmatprep.mubr.bf16.mxu0 %v6038_v40  ;;  %v6094_v40 = vld [vmem:[#allocation3 + $0x718] ss:$36 sps:$4 sm:$0xff]  }
 0x141   :  { %2788 = vmatmul.mubr.bf16.gmra.mrb[100].mxu1 %v6040_v41  ;;  %v6095_v41 = vld [vmem:[#allocation3 + $0x2dc] ss:$36 sps:$4 sm:$0xff]  }
 0x142   :  { %3302 = vmatmul.mubr.bf16.gmra.mrb[68].mxu0 %v6041_v42  ;;  %2795 = vmatprep.mubr.bf16.mxu1 %v6042_v43  ;;  %v6097_v43 = vld [vmem:[#allocation3 + $0x764] ss:$36 sps:$4 sm:$0xff]  }
 0x143   :  { %3309 = vmatprep.mubr.bf16.mxu0 %v6044_v44  ;;  %v6148_v44 = vld [vmem:[#allocation6 + $0x218] sm:$0xff]  }
 0x149   :  { %2796 = vmatmul.mubr.bf16.gmra.mrb[104].mxu1 %v6046_v45  ;;  %v6167_v45 = vld [vmem:[#allocation6 + $0x220] sm:$0xff]  }
 0x14a   :  { %3310 = vmatmul.mubr.bf16.gmra.mrb[72].mxu0 %v6047_v46  ;;  %2803 = vmatprep.mubr.bf16.mxu1 %v6049_v47  ;;  %v6099_v47 = vld [vmem:[#allocation3 + $0x2d8] ss:$36 sps:$4 sm:$0xff]  }
 0x14b   :  { %3317 = vmatprep.mubr.bf16.mxu0 %v6051_v48 }
 0x14c   :  { %v6626_v49 = vpop.f32.mrb[0].mxu1 }
 0x14d   :  { %v2591_v50 = vpop.f32.mrb[1].mxu1 }
 0x14e   :  { %v6628_v52 = vpop.f32.mrb[2].mxu1  ;;  %v6100_v50 = vld [vmem:[#allocation3 + $0x760] ss:$36 sps:$4 sm:$0xff]  }
 0x14f   :  { %v2594_v55 = vpop.f32.mrb[3].mxu1 }
 0x150   :  { %v6186_v55 = vld [vmem:[#allocation6 + $0x228] sm:$0xff]  }
 0x151   :  { %2804 = vmatmul.mubr.bf16.gmra.mrb[108].mxu1 %v6053_v51  ;;  %v6102_v51 = vld [vmem:[#allocation3 + $0x324] ss:$36 sps:$4 sm:$0xff]  }
 0x152   :  { %3318 = vmatmul.mubr.bf16.gmra.mrb[76].mxu0 %v6054_v53  ;;  %2811 = vmatprep.mubr.bf16.mxu1 %v6055_v54  ;;  %v6104_v54 = vld [vmem:[#allocation3 + $0x7ac] ss:$36 sps:$4 sm:$0xff]  }
 0x153   :  { %3325 = vmatprep.mubr.bf16.mxu0 %v6057_v56  ;;  %v6205_v56 = vld [vmem:[#allocation6 + $0x230] sm:$0xff]  }
 0x154   :  { %v6630_v57 = vpop.f32.mrb[4].mxu1 }
 0x155   :  { %v2599_v58 = vpop.f32.mrb[5].mxu1 }
 0x156   :  { %v6632_v60 = vpop.f32.mrb[6].mxu1  ;;  %v6106_v58 = vld [vmem:[#allocation3 + $0x320] ss:$36 sps:$4 sm:$0xff]  }
 0x157   :  { %v2602_v63 = vpop.f32.mrb[7].mxu1 }
 0x158   :  { %v6113_v63 = vld [vmem:[#allocation3 + $0x368] ss:$36 sps:$4 sm:$0xff]  }
 0x159   :  { %2812 = vmatmul.mubr.bf16.gmra.mrb[112].mxu1 %v6059_v59  ;;  %v6107_v59 = vld [vmem:[#allocation3 + $0x7a8] ss:$36 sps:$4 sm:$0xff]  }
 0x15a   :  { %3326 = vmatmul.mubr.bf16.gmra.mrb[80].mxu0 %v6060_v61  ;;  %2819 = vmatprep.mubr.bf16.mxu1 %v6062_v62  ;;  %v6109_v61 = vld [vmem:[#allocation3 + $0x36c] ss:$36 sps:$4 sm:$0xff]   ;;  %v6111_v62 = vld [vmem:[#allocation3 + $0x7f4] ss:$36 sps:$4 sm:$0xff]  }
 0x15b   :  { %3333 = vmatprep.mubr.bf16.mxu0 %v6064_v1  ;;  %v6114_v1 = vld [vmem:[#allocation3 + $0x7f0] ss:$36 sps:$4 sm:$0xff]  }
 0x15c   :  { %v6634_v2 = vpop.f32.mrb[8].mxu1 }
 0x15d   :  { %v2607_v3 = vpop.f32.mrb[9].mxu1 }
 0x15e   :  { %v6636_v5 = vpop.f32.mrb[10].mxu1  ;;  %v6116_v3 = vld [vmem:[#allocation3 + $0x3b4] ss:$36 sps:$4 sm:$0xff]  }
 0x15f   :  { %v2610_v9 = vpop.f32.mrb[11].mxu1 }
 0x160   :  { %v6122_v9 = vld [vmem:[#allocation3 + $0x3fc] ss:$36 sps:$4 sm:$0xff]  }
 0x161   :  { %2820 = vmatmul.mubr.bf16.gmra.mrb[116].mxu1 %v6066_v4  ;;  %v6118_v4 = vld [vmem:[#allocation3 + $0x83c] ss:$36 sps:$4 sm:$0xff]  }
 0x162   :  { %3334 = vmatmul.mubr.bf16.gmra.mrb[84].mxu0 %v6067_v7  ;;  %2827 = vmatprep.mubr.bf16.mxu1 %v6068_v8  ;;  %v6120_v7 = vld [vmem:[#allocation3 + $0x3b0] ss:$36 sps:$4 sm:$0xff]   ;;  %v6121_v8 = vld [vmem:[#allocation3 + $0x838] ss:$36 sps:$4 sm:$0xff]  }
 0x163   :  { %3341 = vmatprep.mubr.bf16.mxu0 %v6070_v10  ;;  %v6124_v10 = vld [vmem:[#allocation3 + $0x884] ss:$36 sps:$4 sm:$0xff]  }
 0x164   :  { %v6638_v11 = vpop.f32.mrb[12].mxu1 }
 0x165   :  { %v2615_v12 = vpop.f32.mrb[13].mxu1 }
 0x166   :  { %v6640_v14 = vpop.f32.mrb[14].mxu1  ;;  %v6224_v12 = vld [vmem:[#allocation6 + $0x238] sm:$0xff]  }
 0x167   :  { %v2618_v17 = vpop.f32.mrb[15].mxu1 }
 0x168   :  { %v6132_v17 = vld [vmem:[#allocation3 + $0x8cc] ss:$36 sps:$4 sm:$0xff]  }
 0x169   :  { %2828 = vmatmul.mubr.bf16.gmra.mrb[120].mxu1 %v6072_v13  ;;  %v6126_v13 = vld [vmem:[#allocation3 + $0x3f8] ss:$36 sps:$4 sm:$0xff]  }
 0x16a   :  { %3342 = vmatmul.mubr.bf16.gmra.mrb[88].mxu0 %v6073_v15  ;;  %2835 = vmatprep.mubr.bf16.mxu1 %v6075_v16  ;;  %v6127_v15 = vld [vmem:[#allocation3 + $0x880] ss:$36 sps:$4 sm:$0xff]  }
 0x16b   :  { %3349 = vmatprep.mubr.bf16.mxu0 %v6077_v18  ;;  %v6130_v16 = vld [vmem:[#allocation3 + $0x444] ss:$36 sps:$4 sm:$0xff]  }
 0x16c   :  { %v6642_v19 = vpop.f32.mrb[16].mxu1  ;;  %v6134_v18 = vld [vmem:[#allocation3 + $0x440] ss:$36 sps:$4 sm:$0xff]  }
 0x16d   :  { %v2623_v20 = vpop.f32.mrb[17].mxu1 }
 0x16e   :  { %v6644_v22 = vpop.f32.mrb[18].mxu1  ;;  %v6135_v20 = vld [vmem:[#allocation3 + $0x8c8] ss:$36 sps:$4 sm:$0xff]  }
 0x16f   :  { %v2626_v25 = vpop.f32.mrb[19].mxu1 }
 0x170   :  { %v6138_v25 = vld [vmem:[#allocation3 + $0x18] ss:$36 sps:$4 sm:$0xff]  }
 0x171   :  { %2836 = vmatmul.mubr.bf16.gmra.mrb[124].mxu1 %v6079_v21  ;;  %v6136_v21 = vld [vmem:[#allocation3 + $0x48c] ss:$36 sps:$4 sm:$0xff]  }
 0x172   :  { %3350 = vmatmul.mubr.bf16.gmra.mrb[92].mxu0 %v6080_v23  ;;  %2940 = vmatprep.mubr.bf16.mxu1 %v6083_v24  ;;  %v6140_v23 = vld [vmem:[#allocation3 + $0x1c] ss:$36 sps:$4 sm:$0xff]   ;;  %v6141_v24 = vld [vmem:[#allocation3 + $0x488] ss:$36 sps:$4 sm:$0xff]  }
 0x173   :  { %3357 = vmatprep.mubr.bf16.mxu0 %v6084_v26  ;;  %v6142_v26 = vld [vmem:[#allocation3 + $0x4d4] ss:$36 sps:$4 sm:$0xff]  }
 0x174   :  { %v6646_v27 = vpop.f32.mrb[20].mxu1 }
 0x175   :  { %v2631_v28 = vpop.f32.mrb[21].mxu1 }
 0x176   :  { %v6648_v30 = vpop.f32.mrb[22].mxu1  ;;  %v6144_v28 = vld [vmem:[#allocation3 + $0x64] ss:$36 sps:$4 sm:$0xff]  }
 0x177   :  { %v2634_v32 = vpop.f32.mrb[23].mxu1 }
 0x178   :  { %v6149_v32 = vld [vmem:[#allocation3 + $0x51c] ss:$36 sps:$4 sm:$0xff]  }
 0x179   :  { %2941 = vmatmul.mubr.bf16.vlgmr.msra.gmra.mrb[32].mxu1 %v6081_v29  ;;  %v6146_v29 = vld [vmem:[#allocation3 + $0x4d0] ss:$36 sps:$4 sm:$0xff]  }
 0x17a   :  { %3358 = vmatmul.mubr.bf16.gmra.mrb[96].mxu0 %v6086_v31  ;;  %5389 = vmatpush3.bf16.msra.mxu1 %v6620_v6  ;;  %v6147_v31 = vld [vmem:[#allocation3 + $0x60] ss:$36 sps:$4 sm:$0xff]  }
 0x17b   :  { %2948 = vmatprep.mubr.bf16.mxu1 %v6089_v33  ;;  %3365 = vmatprep.mubr.bf16.mxu0 %v6091_v34  ;;  %v6151_v33 = vld [vmem:[#allocation3 + $0xac] ss:$36 sps:$4 sm:$0xff]   ;;  %v6153_v34 = vld [vmem:[#allocation3 + $0x518] ss:$36 sps:$4 sm:$0xff]  }
 0x17c   :  { %v6651_v36 = vpop.f32.mrb[24].mxu1  ;;  %5390 = vmatprep.subr.bf16.mxu1 %v6108_v35 }
 0x17d   :  { %v2639_v37 = vpop.f32.mrb[25].mxu1 }
 0x17e   :  { %v6653_v39 = vpop.f32.mrb[26].mxu1  ;;  %5391 = vmatpush3.bf16.msra.mxu1 %v6108_v35  ;;  %v6154_v35 = vld [vmem:[#allocation3 + $0xa8] ss:$36 sps:$4 sm:$0xff]   ;;  %v6157_v37 = vld [vmem:[#allocation3 + $0xf4] ss:$36 sps:$4 sm:$0xff]  }
 0x17f   :  { %v2642_v42 = vpop.f32.mrb[27].mxu1  ;;  %5392 = vmatprep.subr.bf16.mxu1 %v6129_v0 }
 0x180   :  { %v6163_v42 = vld [vmem:[#allocation3 + $0x13c] ss:$36 sps:$4 sm:$0xff]  }
 0x181   :  { %2949 = vmatmul.mubr.bf16.gmra.mrb[36].mxu1 %v6093_v38  ;;  %v6159_v38 = vld [vmem:[#allocation3 + $0x560] ss:$36 sps:$4 sm:$0xff]  }
 0x182   :  { %3366 = vmatmul.mubr.bf16.gmra.mrb[100].mxu0 %v6094_v40  ;;  %2956 = vmatprep.mubr.bf16.mxu1 %v6095_v41  ;;  %v6160_v40 = vld [vmem:[#allocation3 + $0xf0] ss:$36 sps:$4 sm:$0xff]  }
 0x183   :  { %3373 = vmatprep.mubr.bf16.mxu0 %v6097_v43  ;;  %5393 = vmatpush3.bf16.msra.mxu1 %v6129_v0  ;;  %v6155_v0 = vld [vmem:[#allocation3 + $0x564] ss:$36 sps:$4 sm:$0xff]   ;;  %v6161_v41 = vld [vmem:[#allocation3 + $0x5ac] ss:$36 sps:$4 sm:$0xff]  }
 0x184   :  { %v6655_v6 = vpop.f32.mrb[28].mxu1  ;;  %5394 = vmatprep.subr.bf16.mxu1 %v6148_v44  ;;  %v6165_v43 = vld [vmem:[#allocation3 + $0x5a8] ss:$36 sps:$4 sm:$0xff]  }
 0x185   :  { %v2647_v46 = vpop.f32.mrb[29].mxu1 }
 0x186   :  { %v6657_v48 = vpop.f32.mrb[30].mxu1  ;;  %v6170_v46 = vld [vmem:[#allocation3 + $0x184] ss:$36 sps:$4 sm:$0xff]  }
 0x187   :  { %v2650_v53 = vpop.f32.mrb[31].mxu1  ;;  %5395 = vmatpush3.bf16.msra.mxu1 %v6148_v44  ;;  %v6166_v44 = vld [vmem:[#allocation3 + $0x138] ss:$36 sps:$4 sm:$0xff]  }
 0x188   :  { %5396 = vmatprep.subr.bf16.mxu1 %v6167_v45  ;;  %v6176_v53 = vld [vmem:[#allocation3 + $0x1cc] ss:$36 sps:$4 sm:$0xff]  }
 0x189   :  { %2957 = vmatmul.mubr.bf16.gmra.mrb[40].mxu1 %v6099_v47  ;;  %v6172_v47 = vld [vmem:[#allocation3 + $0x5f0] ss:$36 sps:$4 sm:$0xff]  }
 0x18a   :  { %3374 = vmatmul.mubr.bf16.gmra.mrb[104].mxu0 %v6100_v50  ;;  %2964 = vmatprep.mubr.bf16.mxu1 %v6102_v51  ;;  %v6173_v50 = vld [vmem:[#allocation3 + $0x180] ss:$36 sps:$4 sm:$0xff]  }
 0x18b   :  { %3381 = vmatprep.mubr.bf16.mxu0 %v6104_v54  ;;  %5397 = vmatpush3.bf16.msra.mxu1 %v6167_v45  ;;  %v6168_v45 = vld [vmem:[#allocation3 + $0x5f4] ss:$36 sps:$4 sm:$0xff]   ;;  %v6174_v51 = vld [vmem:[#allocation3 + $0x63c] ss:$36 sps:$4 sm:$0xff]  }
 0x18c   :  { %5398 = vmatprep.subr.bf16.mxu1 %v6186_v55  ;;  %v6178_v54 = vld [vmem:[#allocation3 + $0x638] ss:$36 sps:$4 sm:$0xff]  }
 0x18f   :  { %5399 = vmatpush3.bf16.msra.mxu1 %v6186_v55  ;;  %v6179_v55 = vld [vmem:[#allocation3 + $0x1c8] ss:$36 sps:$4 sm:$0xff]  }
 0x190   :  { %5400 = vmatprep.subr.bf16.mxu1 %v6205_v56 }
 0x191   :  { %2965 = vmatmul.mubr.bf16.gmra.mrb[44].mxu1 %v6106_v58  ;;  %v6182_v58 = vld [vmem:[#allocation3 + $0x214] ss:$36 sps:$4 sm:$0xff]  }
 0x192   :  { %3382 = vmatmul.mubr.bf16.gmra.mrb[108].mxu0 %v6107_v59  ;;  %2972 = vmatprep.mubr.bf16.mxu1 %v6109_v61  ;;  %v6184_v59 = vld [vmem:[#allocation3 + $0x680] ss:$36 sps:$4 sm:$0xff]   ;;  %v6185_v61 = vld [vmem:[#allocation3 + $0x210] ss:$36 sps:$4 sm:$0xff]  }
 0x193   :  { %3389 = vmatprep.mubr.bf16.mxu0 %v6111_v62  ;;  %5401 = vmatpush3.bf16.msra.mxu1 %v6205_v56  ;;  %v6180_v56 = vld [vmem:[#allocation3 + $0x684] ss:$36 sps:$4 sm:$0xff]   ;;  %v6187_v62 = vld [vmem:[#allocation3 + $0x6cc] ss:$36 sps:$4 sm:$0xff]  }
 0x194   :  { %5402 = vmatprep.subr.bf16.mxu1 %v6224_v12 }
 0x197   :  { %5403 = vmatpush3.bf16.msra.mxu1 %v6224_v12  ;;  %v6201_v12 = vld [vmem:[#allocation3 + $0x2ec] ss:$36 sps:$4 sm:$0xff]  }
 0x199   :  { %2973 = vmatmul.mubr.bf16.gmra.mrb[48].mxu1 %v6113_v63  ;;  %v6189_v63 = vld [vmem:[#allocation3 + $0x25c] ss:$36 sps:$4 sm:$0xff]  }
 0x19a   :  { %3390 = vmatmul.mubr.bf16.gmra.mrb[112].mxu0 %v6114_v1  ;;  %2980 = vmatprep.mubr.bf16.mxu1 %v6116_v3  ;;  %v6191_v1 = vld [vmem:[#allocation3 + $0x6c8] ss:$36 sps:$4 sm:$0xff]   ;;  %v6192_v3 = vld [vmem:[#allocation3 + $0x258] ss:$36 sps:$4 sm:$0xff]  }
 0x19b   :  { %3397 = vmatprep.mubr.bf16.mxu0 %v6118_v4  ;;  %v6193_v4 = vld [vmem:[#allocation3 + $0x714] ss:$36 sps:$4 sm:$0xff]  }
 0x1a1   :  { %2981 = vmatmul.mubr.bf16.gmra.mrb[52].mxu1 %v6120_v7  ;;  %v6195_v7 = vld [vmem:[#allocation3 + $0x2a4] ss:$36 sps:$4 sm:$0xff]  }
 0x1a2   :  { %3398 = vmatmul.mubr.bf16.gmra.mrb[116].mxu0 %v6121_v8  ;;  %2988 = vmatprep.mubr.bf16.mxu1 %v6122_v9  ;;  %v6197_v8 = vld [vmem:[#allocation3 + $0x710] ss:$36 sps:$4 sm:$0xff]   ;;  %v6198_v9 = vld [vmem:[#allocation3 + $0x2a0] ss:$36 sps:$4 sm:$0xff]  }
 0x1a3   :  { %3405 = vmatprep.mubr.bf16.mxu0 %v6124_v10  ;;  %v6199_v10 = vld [vmem:[#allocation3 + $0x75c] ss:$36 sps:$4 sm:$0xff]  }
 0x1a9   :  { %2989 = vmatmul.mubr.bf16.gmra.mrb[56].mxu1 %v6126_v13  ;;  %v6203_v13 = vld [vmem:[#allocation3 + $0x758] ss:$36 sps:$4 sm:$0xff]  }
 0x1aa   :  { %3406 = vmatmul.mubr.bf16.gmra.mrb[120].mxu0 %v6127_v15  ;;  %2996 = vmatprep.mubr.bf16.mxu1 %v6130_v16  ;;  %v6204_v15 = vld [vmem:[#allocation3 + $0x2e8] ss:$36 sps:$4 sm:$0xff]  }
 0x1ab   :  { %3413 = vmatprep.mubr.bf16.mxu0 %v6132_v17  ;;  %v6206_v16 = vld [vmem:[#allocation3 + $0x7a4] ss:$36 sps:$4 sm:$0xff]   ;;  %v6208_v17 = vld [vmem:[#allocation3 + $0x334] ss:$36 sps:$4 sm:$0xff]  }
 0x1b1   :  { %2997 = vmatmul.mubr.bf16.gmra.mrb[60].mxu1 %v6134_v18  ;;  %v6210_v18 = vld [vmem:[#allocation3 + $0x7a0] ss:$36 sps:$4 sm:$0xff]  }
 0x1b2   :  { %3414 = vmatmul.mubr.bf16.gmra.mrb[124].mxu0 %v6135_v20  ;;  %3004 = vmatprep.mubr.bf16.mxu1 %v6136_v21  ;;  %v6211_v20 = vld [vmem:[#allocation3 + $0x330] ss:$36 sps:$4 sm:$0xff]  }
 0x1b3   :  { %3454 = vmatprep.mubr.bf16.mxu0 %v6140_v23  ;;  %v6212_v21 = vld [vmem:[#allocation3 + $0x7ec] ss:$36 sps:$4 sm:$0xff]   ;;  %v6214_v23 = vld [vmem:[#allocation3 + $0x37c] ss:$36 sps:$4 sm:$0xff]  }
 0x1b9   :  { %3005 = vmatmul.mubr.bf16.gmra.mrb[64].mxu1 %v6141_v24  ;;  %v6216_v24 = vld [vmem:[#allocation3 + $0x7e8] ss:$36 sps:$4 sm:$0xff]  }
 0x1ba   :  { %3455 = vmatmul.mubr.bf16.vlgmr.msra.gmra.mrb[0].mxu0 %v6138_v25  ;;  %3012 = vmatprep.mubr.bf16.mxu1 %v6142_v26  ;;  %v6217_v25 = vld [vmem:[#allocation3 + $0x378] ss:$36 sps:$4 sm:$0xff]  }
 0x1bb   :  { %3462 = vmatprep.mubr.bf16.mxu0 %v6144_v28  ;;  %v6218_v26 = vld [vmem:[#allocation3 + $0x834] ss:$36 sps:$4 sm:$0xff]   ;;  %v6220_v28 = vld [vmem:[#allocation3 + $0x3c4] ss:$36 sps:$4 sm:$0xff]  }
 0x1c1   :  { %3013 = vmatmul.mubr.bf16.gmra.mrb[68].mxu1 %v6146_v29  ;;  %v6222_v29 = vld [vmem:[#allocation3 + $0x830] ss:$36 sps:$4 sm:$0xff]  }
 0x1c2   :  { %3463 = vmatmul.mubr.bf16.gmra.mrb[4].mxu0 %v6147_v31  ;;  %3020 = vmatprep.mubr.bf16.mxu1 %v6149_v32  ;;  %v6223_v31 = vld [vmem:[#allocation3 + $0x3c0] ss:$36 sps:$4 sm:$0xff]  }
 0x1c3   :  { %3470 = vmatprep.mubr.bf16.mxu0 %v6151_v33  ;;  %v6225_v32 = vld [vmem:[#allocation3 + $0x87c] ss:$36 sps:$4 sm:$0xff]   ;;  %v6227_v33 = vld [vmem:[#allocation3 + $0x40c] ss:$36 sps:$4 sm:$0xff]  }
 0x1c9   :  { %3021 = vmatmul.mubr.bf16.gmra.mrb[72].mxu1 %v6153_v34  ;;  %v6229_v34 = vld [vmem:[#allocation3 + $0x878] ss:$36 sps:$4 sm:$0xff]  }
 0x1ca   :  { %3471 = vmatmul.mubr.bf16.gmra.mrb[8].mxu0 %v6154_v35  ;;  %3028 = vmatprep.mubr.bf16.mxu1 %v6155_v0  ;;  %v6230_v35 = vld [vmem:[#allocation3 + $0x408] ss:$36 sps:$4 sm:$0xff]  }
 0x1cb   :  { %3478 = vmatprep.mubr.bf16.mxu0 %v6157_v37  ;;  %v6231_v0 = vld [vmem:[#allocation3 + $0x8c4] ss:$36 sps:$4 sm:$0xff]   ;;  %v6233_v37 = vld [vmem:[#allocation3 + $0x454] ss:$36 sps:$4 sm:$0xff]  }
 0x1d1   :  { %3029 = vmatmul.mubr.bf16.gmra.mrb[76].mxu1 %v6159_v38  ;;  %v6235_v38 = vld [vmem:[#allocation3 + $0x8c0] ss:$36 sps:$4 sm:$0xff]  }
 0x1d2   :  { %3479 = vmatmul.mubr.bf16.gmra.mrb[12].mxu0 %v6160_v40  ;;  %3036 = vmatprep.mubr.bf16.mxu1 %v6161_v41  ;;  %v6236_v40 = vld [vmem:[#allocation3 + $0x450] ss:$36 sps:$4 sm:$0xff]   ;;  %v6239_v41 = vld [vmem:[#allocation3 + $0x20] ss:$36 sps:$4 sm:$0xff]  }
 0x1d3   :  { %3486 = vmatprep.mubr.bf16.mxu0 %v6163_v42  ;;  %v6237_v42 = vld [vmem:[#allocation3 + $0x49c] ss:$36 sps:$4 sm:$0xff]  }
 0x1d9   :  { %3037 = vmatmul.mubr.bf16.gmra.mrb[80].mxu1 %v6165_v43  ;;  %v6241_v43 = vld [vmem:[#allocation3 + $0x68] ss:$36 sps:$4 sm:$0xff]  }
 0x1da   :  { %3487 = vmatmul.mubr.bf16.gmra.mrb[16].mxu0 %v6166_v44  ;;  %3044 = vmatprep.mubr.bf16.mxu1 %v6168_v45  ;;  %v6240_v44 = vld [vmem:[#allocation3 + $0x498] ss:$36 sps:$4 sm:$0xff]   ;;  %v6244_v45 = vld [vmem:[#allocation3 + $0xb0] ss:$36 sps:$4 sm:$0xff]  }
 0x1db   :  { %3494 = vmatprep.mubr.bf16.mxu0 %v6170_v46  ;;  %v6242_v46 = vld [vmem:[#allocation3 + $0x4e4] ss:$36 sps:$4 sm:$0xff]  }
 0x1e1   :  { %3045 = vmatmul.mubr.bf16.gmra.mrb[84].mxu1 %v6172_v47  ;;  %v6246_v47 = vld [vmem:[#allocation3 + $0xf8] ss:$36 sps:$4 sm:$0xff]  }
 0x1e2   :  { %3495 = vmatmul.mubr.bf16.gmra.mrb[20].mxu0 %v6173_v50  ;;  %3052 = vmatprep.mubr.bf16.mxu1 %v6174_v51  ;;  %v6245_v50 = vld [vmem:[#allocation3 + $0x4e0] ss:$36 sps:$4 sm:$0xff]  }
 0x1e3   :  { %3502 = vmatprep.mubr.bf16.mxu0 %v6176_v53  ;;  %v6249_v51 = vld [vmem:[#allocation3 + $0x140] ss:$36 sps:$4 sm:$0xff]   ;;  %v6247_v53 = vld [vmem:[#allocation3 + $0x52c] ss:$36 sps:$4 sm:$0xff]  }
 0x1e9   :  { %3053 = vmatmul.mubr.bf16.gmra.mrb[88].mxu1 %v6178_v54  ;;  %v6251_v54 = vld [vmem:[#allocation3 + $0x188] ss:$36 sps:$4 sm:$0xff]  }
 0x1ea   :  { %3503 = vmatmul.mubr.bf16.gmra.mrb[24].mxu0 %v6179_v55  ;;  %3060 = vmatprep.mubr.bf16.mxu1 %v6180_v56  ;;  %v6250_v55 = vld [vmem:[#allocation3 + $0x528] ss:$36 sps:$4 sm:$0xff]   ;;  %v6254_v56 = vld [vmem:[#allocation3 + $0x1d0] ss:$36 sps:$4 sm:$0xff]  }
 0x1eb   :  { %3510 = vmatprep.mubr.bf16.mxu0 %v6182_v58  ;;  %v6252_v58 = vld [vmem:[#allocation3 + $0x574] ss:$36 sps:$4 sm:$0xff]  }
 0x1f1   :  { %3061 = vmatmul.mubr.bf16.gmra.mrb[92].mxu1 %v6184_v59 }
 0x1f2   :  { %3511 = vmatmul.mubr.bf16.gmra.mrb[28].mxu0 %v6185_v61  ;;  %3068 = vmatprep.mubr.bf16.mxu1 %v6187_v62  ;;  %v6256_v62 = vld [vmem:[#allocation3 + $0x218] ss:$36 sps:$4 sm:$0xff]  }
 0x1f3   :  { %3518 = vmatprep.mubr.bf16.mxu0 %v6189_v63 }
 0x1f9   :  { %3069 = vmatmul.mubr.bf16.gmra.mrb[96].mxu1 %v6191_v1  ;;  %v6255_v1 = vld [vmem:[#allocation3 + $0x570] ss:$36 sps:$4 sm:$0xff]  }
 0x1fa   :  { %3519 = vmatmul.mubr.bf16.gmra.mrb[32].mxu0 %v6192_v3  ;;  %3076 = vmatprep.mubr.bf16.mxu1 %v6193_v4  ;;  %v6259_v3 = vld [vmem:[#allocation3 + $0x260] ss:$36 sps:$4 sm:$0xff]  }
 0x1fb   :  { %3526 = vmatprep.mubr.bf16.mxu0 %v6195_v7  ;;  %v6257_v7 = vld [vmem:[#allocation3 + $0x5bc] ss:$36 sps:$4 sm:$0xff]  }
 0x201   :  { %3077 = vmatmul.mubr.bf16.gmra.mrb[100].mxu1 %v6197_v8 }
 0x202   :  { %3527 = vmatmul.mubr.bf16.gmra.mrb[36].mxu0 %v6198_v9  ;;  %3084 = vmatprep.mubr.bf16.mxu1 %v6199_v10  ;;  %v6261_v10 = vld [vmem:[#allocation3 + $0x2a8] ss:$36 sps:$4 sm:$0xff]  }
 0x203   :  { %3534 = vmatprep.mubr.bf16.mxu0 %v6201_v12 }
 0x209   :  { %3085 = vmatmul.mubr.bf16.gmra.mrb[104].mxu1 %v6203_v13  ;;  %v6260_v13 = vld [vmem:[#allocation3 + $0x5b8] ss:$36 sps:$4 sm:$0xff]  }
 0x20a   :  { %3535 = vmatmul.mubr.bf16.gmra.mrb[40].mxu0 %v6204_v15  ;;  %3092 = vmatprep.mubr.bf16.mxu1 %v6206_v16  ;;  %v6264_v15 = vld [vmem:[#allocation3 + $0x2f0] ss:$36 sps:$4 sm:$0xff]  }
 0x20b   :  { %3542 = vmatprep.mubr.bf16.mxu0 %v6208_v17  ;;  %v6262_v17 = vld [vmem:[#allocation3 + $0x604] ss:$36 sps:$4 sm:$0xff]  }
 0x211   :  { %3093 = vmatmul.mubr.bf16.gmra.mrb[108].mxu1 %v6210_v18 }
 0x212   :  { %3543 = vmatmul.mubr.bf16.gmra.mrb[44].mxu0 %v6211_v20  ;;  %3100 = vmatprep.mubr.bf16.mxu1 %v6212_v21  ;;  %v6266_v21 = vld [vmem:[#allocation3 + $0x338] ss:$36 sps:$4 sm:$0xff]  }
 0x213   :  { %3550 = vmatprep.mubr.bf16.mxu0 %v6214_v23 }
 0x219   :  { %3101 = vmatmul.mubr.bf16.gmra.mrb[112].mxu1 %v6216_v24  ;;  %v6265_v24 = vld [vmem:[#allocation3 + $0x600] ss:$36 sps:$4 sm:$0xff]  }
 0x21a   :  { %3551 = vmatmul.mubr.bf16.gmra.mrb[48].mxu0 %v6217_v25  ;;  %3108 = vmatprep.mubr.bf16.mxu1 %v6218_v26  ;;  %v6269_v25 = vld [vmem:[#allocation3 + $0x380] ss:$36 sps:$4 sm:$0xff]  }
 0x21b   :  { %3558 = vmatprep.mubr.bf16.mxu0 %v6220_v28  ;;  %v6267_v28 = vld [vmem:[#allocation3 + $0x64c] ss:$36 sps:$4 sm:$0xff]  }
 0x221   :  { %3109 = vmatmul.mubr.bf16.gmra.mrb[116].mxu1 %v6222_v29 }
 0x222   :  { %3559 = vmatmul.mubr.bf16.gmra.mrb[52].mxu0 %v6223_v31  ;;  %3116 = vmatprep.mubr.bf16.mxu1 %v6225_v32  ;;  %v6271_v32 = vld [vmem:[#allocation3 + $0x3c8] ss:$36 sps:$4 sm:$0xff]  }
 0x223   :  { %3566 = vmatprep.mubr.bf16.mxu0 %v6227_v33 }
 0x229   :  { %3117 = vmatmul.mubr.bf16.gmra.mrb[120].mxu1 %v6229_v34  ;;  %v6270_v34 = vld [vmem:[#allocation3 + $0x648] ss:$36 sps:$4 sm:$0xff]  }
 0x22a   :  { %3567 = vmatmul.mubr.bf16.gmra.mrb[56].mxu0 %v6230_v35  ;;  %3124 = vmatprep.mubr.bf16.mxu1 %v6231_v0  ;;  %v6274_v35 = vld [vmem:[#allocation3 + $0x410] ss:$36 sps:$4 sm:$0xff]  }
 0x22b   :  { %3574 = vmatprep.mubr.bf16.mxu0 %v6233_v37  ;;  %v6272_v37 = vld [vmem:[#allocation3 + $0x694] ss:$36 sps:$4 sm:$0xff]  }
 0x231   :  { %3125 = vmatmul.mubr.bf16.gmra.mrb[124].mxu1 %v6235_v38 }
 0x232   :  { %3575 = vmatmul.mubr.bf16.gmra.mrb[60].mxu0 %v6236_v40  ;;  %5404 = vmatprep.mubr.bf16.mxu1 %v6239_v41  ;;  %v6276_v41 = vld [vmem:[#allocation3 + $0x458] ss:$36 sps:$4 sm:$0xff]  }
 0x233   :  { %3582 = vmatprep.mubr.bf16.mxu0 %v6237_v42 }
 0x239   :  { %5405 = vmatmul.mubr.bf16.vlgmr.msra.gmra.mrb[128].mxu1 %v6241_v43  ;;  %v6275_v43 = vld [vmem:[#allocation3 + $0x690] ss:$36 sps:$4 sm:$0xff]  }
 0x23a   :  { %3583 = vmatmul.mubr.bf16.gmra.mrb[64].mxu0 %v6240_v44  ;;  %5408 = vmatprep.mubr.bf16.mxu1 %v6244_v45  ;;  %v6279_v44 = vld [vmem:[#allocation3 + $0x4a0] ss:$36 sps:$4 sm:$0xff]  }
 0x23b   :  { %3590 = vmatprep.mubr.bf16.mxu0 %v6242_v46  ;;  %v6277_v46 = vld [vmem:[#allocation3 + $0x6dc] ss:$36 sps:$4 sm:$0xff]  }
 0x241   :  { %5409 = vmatmul.mubr.bf16.gmra.mrb[132].mxu1 %v6246_v47 }
 0x242   :  { %3591 = vmatmul.mubr.bf16.gmra.mrb[68].mxu0 %v6245_v50  ;;  %5412 = vmatprep.mubr.bf16.mxu1 %v6249_v51  ;;  %v6281_v51 = vld [vmem:[#allocation3 + $0x4e8] ss:$36 sps:$4 sm:$0xff]  }
 0x243   :  { %3598 = vmatprep.mubr.bf16.mxu0 %v6247_v53 }
 0x249   :  { %5413 = vmatmul.mubr.bf16.gmra.mrb[136].mxu1 %v6251_v54  ;;  %v6280_v54 = vld [vmem:[#allocation3 + $0x6d8] ss:$36 sps:$4 sm:$0xff]  }
 0x24a   :  { %3599 = vmatmul.mubr.bf16.gmra.mrb[72].mxu0 %v6250_v55  ;;  %5416 = vmatprep.mubr.bf16.mxu1 %v6254_v56  ;;  %v6284_v55 = vld [vmem:[#allocation3 + $0x530] ss:$36 sps:$4 sm:$0xff]  }
 0x24b   :  { %3606 = vmatprep.mubr.bf16.mxu0 %v6252_v58  ;;  %v6282_v58 = vld [vmem:[#allocation3 + $0x724] ss:$36 sps:$4 sm:$0xff]  }
 0x24c   :  { %v6659_v59 = vpop.f32.mrb[32].mxu1 }
 0x24d   :  { %v2944_v61 = vpop.f32.mrb[33].mxu1 }
 0x24e   :  { %v6661_v63 = vpop.f32.mrb[34].mxu1 }
 0x24f   :  { %v2947_v4 = vpop.f32.mrb[35].mxu1 }
 0x250   :  { %v6285_v4 = vld [vmem:[#allocation3 + $0x720] ss:$36 sps:$4 sm:$0xff]  }
 0x251   :  { %5417 = vmatmul.mubr.bf16.gmra.mrb[140].mxu1 %v6256_v62 }
 0x252   :  { %3607 = vmatmul.mubr.bf16.gmra.mrb[76].mxu0 %v6255_v1  ;;  %5420 = vmatprep.mubr.bf16.mxu1 %v6259_v3  ;;  %v6286_v1 = vld [vmem:[#allocation3 + $0x578] ss:$36 sps:$4 sm:$0xff]  }
 0x253   :  { %3614 = vmatprep.mubr.bf16.mxu0 %v6257_v7  ;;  %v6289_v7 = vld [vmem:[#allocation3 + $0x5c0] ss:$36 sps:$4 sm:$0xff]  }
 0x254   :  { %v6663_v8 = vpop.f32.mrb[36].mxu1 }
 0x255   :  { %v2952_v9 = vpop.f32.mrb[37].mxu1 }
 0x256   :  { %v6665_v12 = vpop.f32.mrb[38].mxu1 }
 0x257   :  { %v2955_v16 = vpop.f32.mrb[39].mxu1 }
 0x258   :  { %v6291_v16 = vld [vmem:[#allocation3 + $0x608] ss:$36 sps:$4 sm:$0xff]  }
 0x259   :  { %5421 = vmatmul.mubr.bf16.gmra.mrb[144].mxu1 %v6261_v10  ;;  %v6287_v10 = vld [vmem:[#allocation3 + $0x76c] ss:$36 sps:$4 sm:$0xff]  }
 0x25a   :  { %3615 = vmatmul.mubr.bf16.gmra.mrb[80].mxu0 %v6260_v13  ;;  %5424 = vmatprep.mubr.bf16.mxu1 %v6264_v15 }
 0x25b   :  { %3622 = vmatprep.mubr.bf16.mxu0 %v6262_v17 }
 0x25c   :  { %v6667_v18 = vpop.f32.mrb[40].mxu1 }
 0x25d   :  { %v2960_v20 = vpop.f32.mrb[41].mxu1 }
 0x25e   :  { %v6669_v23 = vpop.f32.mrb[42].mxu1  ;;  %v6290_v20 = vld [vmem:[#allocation3 + $0x768] ss:$36 sps:$4 sm:$0xff]  }
 0x25f   :  { %v2963_v26 = vpop.f32.mrb[43].mxu1 }
 0x261   :  { %5425 = vmatmul.mubr.bf16.gmra.mrb[148].mxu1 %v6266_v21  ;;  %v6294_v21 = vld [vmem:[#allocation3 + $0x650] ss:$36 sps:$4 sm:$0xff]  }
 0x262   :  { %3623 = vmatmul.mubr.bf16.gmra.mrb[84].mxu0 %v6265_v24  ;;  %5428 = vmatprep.mubr.bf16.mxu1 %v6269_v25  ;;  %v6292_v25 = vld [vmem:[#allocation3 + $0x7b4] ss:$36 sps:$4 sm:$0xff]  }
 0x263   :  { %3630 = vmatprep.mubr.bf16.mxu0 %v6267_v28 }
 0x264   :  { %v6671_v29 = vpop.f32.mrb[44].mxu1 }
 0x265   :  { %v2968_v31 = vpop.f32.mrb[45].mxu1 }
 0x266   :  { %v6673_v33 = vpop.f32.mrb[46].mxu1 }
 0x267   :  { %v2971_v0 = vpop.f32.mrb[47].mxu1 }
 0x269   :  { %5429 = vmatmul.mubr.bf16.gmra.mrb[152].mxu1 %v6271_v32  ;;  %v6296_v32 = vld [vmem:[#allocation3 + $0x698] ss:$36 sps:$4 sm:$0xff]  }
 0x26a   :  { %3631 = vmatmul.mubr.bf16.gmra.mrb[88].mxu0 %v6270_v34  ;;  %5432 = vmatprep.mubr.bf16.mxu1 %v6274_v35 }
 0x26b   :  { %3638 = vmatprep.mubr.bf16.mxu0 %v6272_v37  ;;  %v6295_v37 = vld [vmem:[#allocation3 + $0x7b0] ss:$36 sps:$4 sm:$0xff]  }
 0x26c   :  { %v6675_v38 = vpop.f32.mrb[48].mxu1 }
 0x26d   :  { %v2976_v40 = vpop.f32.mrb[49].mxu1 }
 0x26e   :  { %v6677_v42 = vpop.f32.mrb[50].mxu1  ;;  %v6299_v40 = vld [vmem:[#allocation3 + $0x6e0] ss:$36 sps:$4 sm:$0xff]  }
 0x26f   :  { %v2979_v45 = vpop.f32.mrb[51].mxu1 }
 0x271   :  { %5433 = vmatmul.mubr.bf16.gmra.mrb[156].mxu1 %v6276_v41 }
 0x272   :  { %3639 = vmatmul.mubr.bf16.gmra.mrb[92].mxu0 %v6275_v43  ;;  %5436 = vmatprep.mubr.bf16.mxu1 %v6279_v44  ;;  %v6297_v44 = vld [vmem:[#allocation3 + $0x7fc] ss:$36 sps:$4 sm:$0xff]  }
 0x273   :  { %3646 = vmatprep.mubr.bf16.mxu0 %v6277_v46 }
 0x274   :  { %v6679_v47 = vpop.f32.mrb[52].mxu1 }
 0x275   :  { %v2984_v50 = vpop.f32.mrb[53].mxu1 }
 0x276   :  { %v6681_v53 = vpop.f32.mrb[54].mxu1 }
 0x277   :  { %v2987_v56 = vpop.f32.mrb[55].mxu1 }
 0x279   :  { %5437 = vmatmul.mubr.bf16.gmra.mrb[160].mxu1 %v6281_v51 }
 0x27a   :  { %3647 = vmatmul.mubr.bf16.gmra.mrb[96].mxu0 %v6280_v54  ;;  %5440 = vmatprep.mubr.bf16.mxu1 %v6284_v55  ;;  %v6301_v54 = vld [vmem:[#allocation3 + $0x728] ss:$36 sps:$4 sm:$0xff]  }
 0x27b   :  { %3654 = vmatprep.mubr.bf16.mxu0 %v6282_v58 }
 0x27c   :  { %v6683_v61 = vpop.f32.mrb[56].mxu1 }
 0x27d   :  { %v2992_v62 = vpop.f32.mrb[57].mxu1 }
 0x27e   :  { %v6685_v3 = vpop.f32.mrb[58].mxu1  ;;  %v6300_v62 = vld [vmem:[#allocation3 + $0x7f8] ss:$36 sps:$4 sm:$0xff]  }
 0x27f   :  { %v2995_v9 = vpop.f32.mrb[59].mxu1 }
 0x281   :  { %5441 = vmatmul.mubr.bf16.gmra.mrb[164].mxu1 %v6286_v1  ;;  %v6304_v1 = vld [vmem:[#allocation3 + $0x770] ss:$36 sps:$4 sm:$0xff]  }
 0x282   :  { %3655 = vmatmul.mubr.bf16.gmra.mrb[100].mxu0 %v6285_v4  ;;  %5444 = vmatprep.mubr.bf16.mxu1 %v6289_v7  ;;  %v6302_v7 = vld [vmem:[#allocation3 + $0x844] ss:$36 sps:$4 sm:$0xff]  }
 0x283   :  { %3662 = vmatprep.mubr.bf16.mxu0 %v6287_v10 }
 0x284   :  { %v6687_v13 = vpop.f32.mrb[60].mxu1 }
 0x285   :  { %v3000_v15 = vpop.f32.mrb[61].mxu1 }
 0x286   :  { %v6689_v17 = vpop.f32.mrb[62].mxu1 }
 0x287   :  { %v3003_v24 = vpop.f32.mrb[63].mxu1 }
 0x289   :  { %5445 = vmatmul.mubr.bf16.gmra.mrb[168].mxu1 %v6291_v16 }
 0x28a   :  { %3663 = vmatmul.mubr.bf16.gmra.mrb[104].mxu0 %v6290_v20  ;;  %5448 = vmatprep.mubr.bf16.mxu1 %v6294_v21  ;;  %v6306_v20 = vld [vmem:[#allocation3 + $0x7b8] ss:$36 sps:$4 sm:$0xff]  }
 0x28b   :  { %3670 = vmatprep.mubr.bf16.mxu0 %v6292_v25 }
 0x28c   :  { %v6691_v26 = vpop.f32.mrb[64].mxu1 }
 0x28d   :  { %v3456_v28 = vpop.f32.mrb[0].mxu0  ;;  %v3008_v31 = vpop.f32.mrb[65].mxu1 }
 0x28e   :  { %v6694_v34 = vadd.f32 %v3456_v28, %v6626_v49  ;;  %v3458_v35 = vpop.f32.mrb[1].mxu0  ;;  %v6696_v0 = vpop.f32.mrb[66].mxu1  ;;  %v6305_v28 = vld [vmem:[#allocation3 + $0x840] ss:$36 sps:$4 sm:$0xff]  }
 0x28f   :  { %v3459_v41 = vpop.f32.mrb[2].mxu0  ;;  %v3011_v43 = vpop.f32.mrb[67].mxu1  ;;  %v6309_v31 = vld [vmem:[#allocation3 + $0x800] ss:$36 sps:$4 sm:$0xff]   ;;  %v6307_v35 = vld [vmem:[#allocation3 + $0x88c] ss:$36 sps:$4 sm:$0xff]  }
 0x290   :  { %v6699_v45 = vadd.f32 %v3459_v41, %v6628_v52  ;;  %v3461_v46 = vpop.f32.mrb[3].mxu0 }
 0x291   :  { %5449 = vmatmul.mubr.bf16.gmra.mrb[172].mxu1 %v6296_v32 }
 0x292   :  { %3671 = vmatmul.mubr.bf16.gmra.mrb[108].mxu0 %v6295_v37  ;;  %5452 = vmatprep.mubr.bf16.mxu1 %v6299_v40 }
 0x293   :  { %3678 = vmatprep.mubr.bf16.mxu0 %v6297_v44  ;;  %v6311_v44 = vld [vmem:[#allocation3 + $0x848] ss:$36 sps:$4 sm:$0xff]  }
 0x294   :  { %v6701_v50 = vpop.f32.mrb[68].mxu1 }
 0x295   :  { %v3464_v49 = vpop.f32.mrb[4].mxu0  ;;  %v3016_v51 = vpop.f32.mrb[69].mxu1 }
 0x296   :  { %v6704_v55 = vadd.f32 %v3464_v49, %v6630_v57  ;;  %v3466_v56 = vpop.f32.mrb[5].mxu0  ;;  %v6706_v58 = vpop.f32.mrb[70].mxu1 }
 0x297   :  { %v3467_v52 = vpop.f32.mrb[6].mxu0  ;;  %v3019_v4 = vpop.f32.mrb[71].mxu1  ;;  %v6314_v56 = vld [vmem:[#allocation3 + $0x890] ss:$36 sps:$4 sm:$0xff]  }
 0x298   :  { %v6709_v9 = vadd.f32 %v3467_v52, %v6632_v60  ;;  %v3469_v10 = vpop.f32.mrb[7].mxu0 }
 0x299   :  { %5453 = vmatmul.mubr.bf16.gmra.mrb[176].mxu1 %v6301_v54  ;;  %v6310_v54 = vld [vmem:[#allocation3 + $0x888] ss:$36 sps:$4 sm:$0xff]  }
 0x29a   :  { %3679 = vmatmul.mubr.bf16.gmra.mrb[112].mxu0 %v6300_v62  ;;  %5456 = vmatprep.mubr.bf16.mxu1 %v6304_v1  ;;  %v6312_v1 = vld [vmem:[#allocation3 + $0x8d4] ss:$36 sps:$4 sm:$0xff]  }
 0x29b   :  { %3686 = vmatprep.mubr.bf16.mxu0 %v6302_v7 }
 0x29c   :  { %v6711_v15 = vpop.f32.mrb[72].mxu1 }
 0x29d   :  { %v3472_v57 = vpop.f32.mrb[8].mxu0  ;;  %v3024_v16 = vpop.f32.mrb[73].mxu1 }
 0x29e   :  { %v6714_v21 = vadd.f32 %v3472_v57, %v6634_v2  ;;  %v3474_v24 = vpop.f32.mrb[9].mxu0  ;;  %v6716_v25 = vpop.f32.mrb[74].mxu1  ;;  %v6316_v57 = vld [vmem:[#allocation3 + $0x8d8] ss:$36 sps:$4 sm:$0xff]  }
 0x29f   :  { %v3475_v60 = vpop.f32.mrb[10].mxu0  ;;  %v3027_v32 = vpop.f32.mrb[75].mxu1 }
 0x2a0   :  { %v6719_v37 = vadd.f32 %v3475_v60, %v6636_v5  ;;  %v3477_v40 = vpop.f32.mrb[11].mxu0 }
 0x2a1   :  { %5457 = vmatmul.mubr.bf16.gmra.mrb[180].mxu1 %v6306_v20 }
 0x2a2   :  { %3687 = vmatmul.mubr.bf16.gmra.mrb[116].mxu0 %v6305_v28  ;;  %5460 = vmatprep.mubr.bf16.mxu1 %v6309_v31  ;;  %v6315_v28 = vld [vmem:[#allocation3 + $0x8d0] ss:$36 sps:$4 sm:$0xff]  }
 0x2a3   :  { %3694 = vmatprep.mubr.bf16.mxu0 %v6307_v35 }
 0x2a4   :  { %v6721_v41 = vpop.f32.mrb[76].mxu1 }
 0x2a5   :  { %v3480_v2 = vpop.f32.mrb[12].mxu0  ;;  %v3032_v43 = vpop.f32.mrb[77].mxu1 }
 0x2a6   :  { %v6724_v46 = vadd.f32 %v3480_v2, %v6638_v11  ;;  %v3482_v49 = vpop.f32.mrb[13].mxu0  ;;  %v6726_v51 = vpop.f32.mrb[78].mxu1 }
 0x2a7   :  { %v3483_v5 = vpop.f32.mrb[14].mxu0  ;;  %v3035_v62 = vpop.f32.mrb[79].mxu1 }
 0x2a8   :  { %v6729_v52 = vadd.f32 %v3483_v5, %v6640_v14  ;;  %v3485_v4 = vpop.f32.mrb[15].mxu0 }
 0x2a9   :  { %5461 = vmatmul.mubr.bf16.gmra.mrb[184].mxu1 %v6311_v44 }
 0x2aa   :  { %3695 = vmatmul.mubr.bf16.gmra.mrb[120].mxu0 %v6310_v54  ;;  %5464 = vmatprep.mubr.bf16.mxu1 %v6314_v56 }
 0x2ab   :  { %3702 = vmatprep.mubr.bf16.mxu0 %v6312_v1 }
 0x2ac   :  { %v6731_v7 = vpop.f32.mrb[80].mxu1 }
 0x2ad   :  { %v3488_v11 = vpop.f32.mrb[16].mxu0  ;;  %v3040_v10 = vpop.f32.mrb[81].mxu1 }
 0x2ae   :  { %v6734_v16 = vadd.f32 %v3488_v11, %v6642_v19  ;;  %v3490_v20 = vpop.f32.mrb[17].mxu0  ;;  %v6736_v24 = vpop.f32.mrb[82].mxu1 }
 0x2af   :  { %v3491_v31 = vpop.f32.mrb[18].mxu0  ;;  %v3043_v14 = vpop.f32.mrb[83].mxu1 }
 0x2b0   :  { %v6739_v60 = vadd.f32 %v3491_v31, %v6644_v22  ;;  %v3493_v32 = vpop.f32.mrb[19].mxu0 }
 0x2b1   :  { %5465 = vmatmul.mubr.bf16.gmra.mrb[188].mxu1 %v6316_v57 }
 0x2b2   :  { %3703 = vmatmul.mubr.bf16.gmra.mrb[124].mxu0 %v6315_v28 }
 0x2b4   :  { %v6741_v35 = vpop.f32.mrb[84].mxu1 }
 0x2b5   :  { %v3496_v40 = vpop.f32.mrb[20].mxu0  ;;  %v3048_v2 = vpop.f32.mrb[85].mxu1 }
 0x2b6   :  { %v6744_v43 = vadd.f32 %v3496_v40, %v6646_v27  ;;  %v3498_v19 = vpop.f32.mrb[21].mxu0  ;;  %v6746_v44 = vpop.f32.mrb[86].mxu1 }
 0x2b7   :  { %v3499_v49 = vpop.f32.mrb[22].mxu0  ;;  %v3051_v54 = vpop.f32.mrb[87].mxu1 }
 0x2b8   :  { %v6749_v56 = vadd.f32 %v3499_v49, %v6648_v30  ;;  %v3501_v22 = vpop.f32.mrb[23].mxu0 }
 0x2bc   :  { %v6751_v5 = vpop.f32.mrb[88].mxu1 }
 0x2bd   :  { %v3504_v62 = vpop.f32.mrb[24].mxu0  ;;  %v3056_v1 = vpop.f32.mrb[89].mxu1 }
 0x2be   :  { %v6754_v4 = vadd.f32 %v3504_v62, %v6651_v36  ;;  %v3506_v11 = vpop.f32.mrb[25].mxu0  ;;  %v6756_v10 = vpop.f32.mrb[90].mxu1 }
 0x2bf   :  { %v3507_v27 = vpop.f32.mrb[26].mxu0  ;;  %v3059_v57 = vpop.f32.mrb[91].mxu1 }
 0x2c0   :  { %v6759_v20 = vadd.f32 %v3507_v27, %v6653_v39  ;;  %v3509_v28 = vpop.f32.mrb[27].mxu0 }
 0x2c4   :  { %v6761_v31 = vpop.f32.mrb[92].mxu1 }
 0x2c5   :  { %v3512_v30 = vpop.f32.mrb[28].mxu0  ;;  %v3064_v14 = vpop.f32.mrb[93].mxu1 }
 0x2c6   :  { %v6764_v32 = vadd.f32 %v3512_v30, %v6655_v6  ;;  %v3514_v40 = vpop.f32.mrb[29].mxu0  ;;  %v6766_v2 = vpop.f32.mrb[94].mxu1 }
 0x2c7   :  { %v3515_v36 = vpop.f32.mrb[30].mxu0  ;;  %v3067_v19 = vpop.f32.mrb[95].mxu1 }
 0x2c8   :  { %v6769_v49 = vadd.f32 %v3515_v36, %v6657_v48  ;;  %v3517_v54 = vpop.f32.mrb[31].mxu0 }
 0x2cc   :  { %v6771_v22 = vpop.f32.mrb[96].mxu1 }
 0x2cd   :  { %7066 = vst [vmem:[#allocation13_spill] sm:$0xff] %v6771_v22  ;;  %v3520_v39 = vpop.f32.mrb[32].mxu0  ;;  %v3072_v62 = vpop.f32.mrb[97].mxu1 }
 0x2ce   :  { %v6774_v1 = vadd.f32 %v3520_v39, %v6659_v59  ;;  %v3522_v11 = vpop.f32.mrb[33].mxu0  ;;  %v6776_v27 = vpop.f32.mrb[98].mxu1 }
 0x2cf   :  { %7067 = vst [vmem:[#allocation14_spill] sm:$0xff] %v6776_v27  ;;  %v3523_v6 = vpop.f32.mrb[34].mxu0  ;;  %v3075_v57 = vpop.f32.mrb[99].mxu1 }
 0x2d0   :  { %v6779_v28 = vadd.f32 %v3523_v6, %v6661_v63  ;;  %v3525_v30 = vpop.f32.mrb[35].mxu0 }
 0x2d4   :  { %v6781_v14 = vpop.f32.mrb[100].mxu1 }
 0x2d5   :  { %7068 = vst [vmem:[#allocation15_spill] sm:$0xff] %v6781_v14  ;;  %v3528_v48 = vpop.f32.mrb[36].mxu0  ;;  %v3080_v40 = vpop.f32.mrb[101].mxu1 }
 0x2d6   :  { %v6784_v36 = vadd.f32 %v3528_v48, %v6663_v8  ;;  %v3530_v19 = vpop.f32.mrb[37].mxu0  ;;  %v6786_v54 = vpop.f32.mrb[102].mxu1 }
 0x2d7   :  { %7069 = vst [vmem:[#allocation16_spill] sm:$0xff] %v6786_v54  ;;  %v3531_v59 = vpop.f32.mrb[38].mxu0  ;;  %v3083_v39 = vpop.f32.mrb[103].mxu1 }
 0x2d8   :  { %v6789_v62 = vadd.f32 %v3531_v59, %v6665_v12  ;;  %v3533_v11 = vpop.f32.mrb[39].mxu0 }
 0x2dc   :  { %v6791_v57 = vpop.f32.mrb[104].mxu1 }
 0x2dd   :  { %7070 = vst [vmem:[#allocation17_spill] sm:$0xff] %v6791_v57  ;;  %v3536_v63 = vpop.f32.mrb[40].mxu0  ;;  %v3088_v6 = vpop.f32.mrb[105].mxu1 }
 0x2de   :  { %v6794_v30 = vadd.f32 %v3536_v63, %v6667_v18  ;;  %v3538_v40 = vpop.f32.mrb[41].mxu0  ;;  %v6796_v14 = vpop.f32.mrb[106].mxu1 }
 0x2df   :  { %7071 = vst [vmem:[#allocation18_spill] sm:$0xff] %v6796_v14  ;;  %v3539_v8 = vpop.f32.mrb[42].mxu0  ;;  %v3091_v48 = vpop.f32.mrb[107].mxu1 }
 0x2e0   :  { %v6799_v19 = vadd.f32 %v3539_v8, %v6669_v23  ;;  %v3541_v39 = vpop.f32.mrb[43].mxu0 }
 0x2e4   :  { %v6801_v54 = vpop.f32.mrb[108].mxu1 }
 0x2e5   :  { %7072 = vst [vmem:[#allocation19_spill] sm:$0xff] %v6801_v54  ;;  %v3544_v12 = vpop.f32.mrb[44].mxu0  ;;  %v3096_v59 = vpop.f32.mrb[109].mxu1 }
 0x2e6   :  { %v6804_v11 = vadd.f32 %v3544_v12, %v6671_v29  ;;  %v3546_v6 = vpop.f32.mrb[45].mxu0  ;;  %v6806_v57 = vpop.f32.mrb[110].mxu1 }
 0x2e7   :  { %7073 = vst [vmem:[#allocation20_spill] sm:$0xff] %v6806_v57  ;;  %v3547_v18 = vpop.f32.mrb[46].mxu0  ;;  %v3099_v63 = vpop.f32.mrb[111].mxu1 }
 0x2e8   :  { %v6809_v40 = vadd.f32 %v3547_v18, %v6673_v33  ;;  %v3549_v48 = vpop.f32.mrb[47].mxu0 }
 0x2ec   :  { %v6811_v14 = vpop.f32.mrb[112].mxu1 }
 0x2ed   :  { %7074 = vst [vmem:[#allocation21_spill] sm:$0xff] %v6811_v14  ;;  %v3552_v23 = vpop.f32.mrb[48].mxu0  ;;  %v3104_v8 = vpop.f32.mrb[113].mxu1 }
 0x2ee   :  { %v6814_v39 = vadd.f32 %v3552_v23, %v6675_v38  ;;  %v3554_v59 = vpop.f32.mrb[49].mxu0  ;;  %v6816_v54 = vpop.f32.mrb[114].mxu1 }
 0x2ef   :  { %7075 = vst [vmem:[#allocation22_spill] sm:$0xff] %v6816_v54  ;;  %v3555_v29 = vpop.f32.mrb[50].mxu0  ;;  %v3107_v12 = vpop.f32.mrb[115].mxu1 }
 0x2f0   :  { %v6819_v6 = vadd.f32 %v3555_v29, %v6677_v42  ;;  %v3557_v63 = vpop.f32.mrb[51].mxu0 }
 0x2f4   :  { %v6821_v57 = vpop.f32.mrb[116].mxu1 }
 0x2f5   :  { %7076 = vst [vmem:[#allocation23_spill] sm:$0xff] %v6821_v57  ;;  %v3560_v33 = vpop.f32.mrb[52].mxu0  ;;  %v3112_v18 = vpop.f32.mrb[117].mxu1 }
 0x2f6   :  { %v6824_v48 = vadd.f32 %v3560_v33, %v6679_v47  ;;  %v3562_v8 = vpop.f32.mrb[53].mxu0  ;;  %v6826_v14 = vpop.f32.mrb[118].mxu1 }
 0x2f7   :  { %7077 = vst [vmem:[#allocation24_spill] sm:$0xff] %v6826_v14  ;;  %v3563_v38 = vpop.f32.mrb[54].mxu0  ;;  %v3115_v23 = vpop.f32.mrb[119].mxu1 }
 0x2f8   :  { %v6829_v59 = vadd.f32 %v3563_v38, %v6681_v53  ;;  %v3565_v12 = vpop.f32.mrb[55].mxu0 }
 0x2fc   :  { %v6831_v54 = vpop.f32.mrb[120].mxu1 }
 0x2fd   :  { %7078 = vst [vmem:[#allocation25_spill] sm:$0xff] %v6831_v54  ;;  %v3568_v42 = vpop.f32.mrb[56].mxu0  ;;  %v3120_v29 = vpop.f32.mrb[121].mxu1 }
 0x2fe   :  { %v6834_v63 = vadd.f32 %v3568_v42, %v6683_v61  ;;  %v3570_v18 = vpop.f32.mrb[57].mxu0  ;;  %v6836_v57 = vpop.f32.mrb[122].mxu1 }
 0x2ff   :  { %7079 = vst [vmem:[#allocation26_spill] sm:$0xff] %v6836_v57  ;;  %v3571_v47 = vpop.f32.mrb[58].mxu0  ;;  %v3123_v33 = vpop.f32.mrb[123].mxu1 }
 0x300   :  { %v6839_v8 = vadd.f32 %v3571_v47, %v6685_v3  ;;  %v3573_v23 = vpop.f32.mrb[59].mxu0  ;;  %v6851_v3 = vld [vmem:[#allocation8] ss:$0 sm:$0xff] }
 0x302   :  { %7080 = vst [vmem:[#allocation27_spill] sm:$0xff] %v6839_v8 }
 0x304   :  { %v6841_v14 = vpop.f32.mrb[124].mxu1 }
 0x305   :  { %7081 = vst [vmem:[#allocation28_spill] sm:$0xff] %v6841_v14  ;;  %v3576_v53 = vpop.f32.mrb[60].mxu0  ;;  %v3128_v38 = vpop.f32.mrb[125].mxu1 }
 0x306   :  { %v6844_v12 = vadd.f32 %v3576_v53, %v6687_v13  ;;  %v3578_v29 = vpop.f32.mrb[61].mxu0  ;;  %v6846_v54 = vpop.f32.mrb[126].mxu1 }
 0x307   :  { %7082 = vst [vmem:[#allocation29_spill] sm:$0xff] %v6846_v54  ;;  %v3579_v61 = vpop.f32.mrb[62].mxu0  ;;  %v3131_v42 = vpop.f32.mrb[127].mxu1 }
 0x308   :  { %v6849_v18 = vadd.f32 %v3579_v61, %v6689_v17  ;;  %v3581_v33 = vpop.f32.mrb[63].mxu0 }
 0x30c   :  { %v5406_v57 = vpop.f32.mrb[128].mxu1 }
 0x30d   :  { %v3584_v47 = vpop.f32.mrb[64].mxu0  ;;  %v3754_v23 = vadd.f32 %v6704_v55, %v5406_v57  ;;  %v3745_v14 = vpop.f32.mrb[129].mxu1 }
 0x30e   :  { %v6855_v38 = vadd.f32 %v3584_v47, %v6691_v26  ;;  %v3586_v13 = vpop.f32.mrb[65].mxu0  ;;  %v3746_v53 = vadd.f32 %v6694_v34, %v3745_v14  ;;  %v5407_v29 = vpop.f32.mrb[130].mxu1 }
 0x30f   :  { %v4204_v42 = vadd.f32 %v6851_v3, %v3754_v23  ;;  %v3587_v54 = vpop.f32.mrb[66].mxu0  ;;  %v3757_v17 = vadd.f32 %v6709_v9, %v5407_v29  ;;  %v3748_v61 = vpop.f32.mrb[131].mxu1 }
 0x310   :  { %7083 = vst [vmem:[#allocation30_spill] sm:$0xff] %v6855_v38  ;;  %v4202_v33 = vadd.f32 %v6851_v3, %v3746_v53  ;;  %v6862_v27 = vadd.f32 %v3587_v54, %v6696_v0  ;;  %v3589_v55 = vpop.f32.mrb[67].mxu0  ;;  %v3749_v57 = vadd.f32 %v6699_v45, %v3748_v61 }
 0x311   :  { %v4205_v26 = vadd.f32 %v6851_v3, %v3757_v17  ;;  %v4268_v34 = vmax.f32 %v4204_v42, 0.0 }
 0x312   :  { %v4203_v47 = vadd.f32 %v6851_v3, %v3749_v57  ;;  %v4266_v13 = vmax.f32 %v4202_v33, 0.0 }
 0x313   :  { %v4269_v14 = vmax.f32 %v4205_v26, 0.0 }
 0x314   :  { %v4267_v23 = vmax.f32 %v4203_v47, 0.0  ;;  %v5410_v38 = vpop.f32.mrb[132].mxu1 }
 0x315   :  { %v5165_v22 = vpack.c.bf16 %v4269_v14, %v4268_v34  ;;  %v3592_v9 = vpop.f32.mrb[68].mxu0  ;;  %v3770_v29 = vadd.f32 %v6724_v46, %v5410_v38  ;;  %v3761_v53 = vpop.f32.mrb[133].mxu1 }
 0x316   :  { %v5160_v8 = vpack.c.bf16 %v4267_v23, %v4266_v13  ;;  %v6869_v0 = vadd.f32 %v3592_v9, %v6701_v50  ;;  %v3594_v54 = vpop.f32.mrb[69].mxu0  ;;  %v3762_v45 = vadd.f32 %v6714_v21, %v3761_v53  ;;  %v5411_v17 = vpop.f32.mrb[134].mxu1 }
 0x317   :  { %5317 = vst [vmem:[#allocation9 + $0x8] sm:$0xff] %v5165_v22   ;;  %v4208_v42 = vadd.f32 %v6851_v3, %v3770_v29  ;;  %v3595_v61 = vpop.f32.mrb[70].mxu0  ;;  %v3773_v33 = vadd.f32 %v6729_v52, %v5411_v17  ;;  %v3764_v55 = vpop.f32.mrb[135].mxu1 }
 0x318   :  { %5161 = vst [vmem:[#allocation9] sm:$0xff] %v5160_v8   ;;  %v4206_v57 = vadd.f32 %v6851_v3, %v3762_v45  ;;  %v6876_v46 = vadd.f32 %v3595_v61, %v6706_v58  ;;  %v3597_v38 = vpop.f32.mrb[71].mxu0  ;;  %v3765_v50 = vadd.f32 %v6719_v37, %v3764_v55 }
 0x319   :  { %v4209_v26 = vadd.f32 %v6851_v3, %v3773_v33  ;;  %v4272_v22 = vmax.f32 %v4208_v42, 0.0 }
 0x31a   :  { %v4207_v21 = vadd.f32 %v6851_v3, %v3765_v50  ;;  %v4270_v34 = vmax.f32 %v4206_v57, 0.0 }
 0x31b   :  { %v4273_v47 = vmax.f32 %v4209_v26, 0.0 }
 0x31c   :  { %v4271_v14 = vmax.f32 %v4207_v21, 0.0  ;;  %v5414_v13 = vpop.f32.mrb[136].mxu1 }
 0x31d   :  { %v5175_v52 = vpack.c.bf16 %v4273_v47, %v4272_v22  ;;  %v3600_v23 = vpop.f32.mrb[72].mxu0  ;;  %v3786_v8 = vadd.f32 %v6744_v43, %v5414_v13  ;;  %v3777_v9 = vpop.f32.mrb[137].mxu1 }
 0x31e   :  { %v5170_v29 = vpack.c.bf16 %v4271_v14, %v4270_v34  ;;  %v6883_v58 = vadd.f32 %v3600_v23, %v6711_v15  ;;  %v3602_v53 = vpop.f32.mrb[73].mxu0  ;;  %v3778_v37 = vadd.f32 %v6734_v16, %v3777_v9  ;;  %v5415_v54 = vpop.f32.mrb[138].mxu1 }
 0x31f   :  { %5319 = vst [vmem:[#allocation9 + $0x18] sm:$0xff] %v5175_v52   ;;  %v4212_v45 = vadd.f32 %v6851_v3, %v3786_v8  ;;  %v3603_v17 = vpop.f32.mrb[74].mxu0  ;;  %v3789_v42 = vadd.f32 %v6749_v56, %v5415_v54  ;;  %v3780_v61 = vpop.f32.mrb[139].mxu1 }
 0x320   :  { %5318 = vst [vmem:[#allocation9 + $0x10] sm:$0xff] %v5170_v29   ;;  %v4210_v33 = vadd.f32 %v6851_v3, %v3778_v37  ;;  %v6890_v43 = vadd.f32 %v3603_v17, %v6716_v25  ;;  %v3605_v55 = vpop.f32.mrb[75].mxu0  ;;  %v3781_v15 = vadd.f32 %v6739_v60, %v3780_v61 }
 0x321   :  { %v4213_v57 = vadd.f32 %v6851_v3, %v3789_v42  ;;  %v4276_v38 = vmax.f32 %v4212_v45, 0.0 }
 0x322   :  { %v4211_v16 = vadd.f32 %v6851_v3, %v3781_v15  ;;  %v4274_v26 = vmax.f32 %v4210_v33, 0.0 }
 0x323   :  { %v4277_v50 = vmax.f32 %v4213_v57, 0.0 }
 0x324   :  { %v4275_v21 = vmax.f32 %v4211_v16, 0.0  ;;  %v5418_v22 = vpop.f32.mrb[140].mxu1 }
 0x325   :  { %v5185_v56 = vpack.c.bf16 %v4277_v50, %v4276_v38  ;;  %v3608_v47 = vpop.f32.mrb[76].mxu0  ;;  %v3802_v34 = vadd.f32 %v6764_v32, %v5418_v22  ;;  %v3793_v14 = vpop.f32.mrb[141].mxu1 }
 0x326   :  { %v5180_v13 = vpack.c.bf16 %v4275_v21, %v4274_v26  ;;  %v6897_v25 = vadd.f32 %v3608_v47, %v6721_v41  ;;  %v3610_v52 = vpop.f32.mrb[77].mxu0  ;;  %v3794_v60 = vadd.f32 %v6754_v4, %v3793_v14  ;;  %v5419_v23 = vpop.f32.mrb[142].mxu1 }
 0x327   :  { %5321 = vst [vmem:[#allocation9 + $0x28] sm:$0xff] %v5185_v56   ;;  %v4216_v8 = vadd.f32 %v6851_v3, %v3802_v34  ;;  %v3611_v9 = vpop.f32.mrb[78].mxu0  ;;  %v3805_v29 = vadd.f32 %v6769_v49, %v5419_v23  ;;  %v3796_v53 = vpop.f32.mrb[143].mxu1 }
 0x328   :  { %5320 = vst [vmem:[#allocation9 + $0x20] sm:$0xff] %v5180_v13   ;;  %v4214_v37 = vadd.f32 %v6851_v3, %v3794_v60  ;;  %v6904_v32 = vadd.f32 %v3611_v9, %v6726_v51  ;;  %v3613_v54 = vpop.f32.mrb[79].mxu0  ;;  %v3797_v41 = vadd.f32 %v6759_v20, %v3796_v53 }
 0x329   :  { %v4217_v45 = vadd.f32 %v6851_v3, %v3805_v29  ;;  %v4280_v17 = vmax.f32 %v4216_v8, 0.0 }
 0x32a   :  { %v4215_v4 = vadd.f32 %v6851_v3, %v3797_v41  ;;  %v4278_v61 = vmax.f32 %v4214_v37, 0.0 }
 0x32b   :  { %v4281_v42 = vmax.f32 %v4217_v45, 0.0 }
 0x32c   :  { %v4279_v33 = vmax.f32 %v4215_v4, 0.0  ;;  %v5422_v55 = vpop.f32.mrb[144].mxu1 }
 0x32d   :  { %v5195_v49 = vpack.c.bf16 %v4281_v42, %v4280_v17  ;;  %v3616_v15 = vpop.f32.mrb[80].mxu0  ;;  %v3818_v57 = vadd.f32 %v6784_v36, %v5422_v55  ;;  %v3809_v16 = vpop.f32.mrb[145].mxu1 }
 0x32e   :  { %v5190_v38 = vpack.c.bf16 %v4279_v33, %v4278_v61  ;;  %v6911_v51 = vadd.f32 %v3616_v15, %v6731_v7  ;;  %v3618_v50 = vpop.f32.mrb[81].mxu0  ;;  %v3810_v20 = vadd.f32 %v6774_v1, %v3809_v16  ;;  %v5423_v26 = vpop.f32.mrb[146].mxu1 }
 0x32f   :  { %5323 = vst [vmem:[#allocation9 + $0x38] sm:$0xff] %v5195_v49   ;;  %v4220_v21 = vadd.f32 %v6851_v3, %v3818_v57  ;;  %v3619_v22 = vpop.f32.mrb[82].mxu0  ;;  %v3821_v56 = vadd.f32 %v6789_v62, %v5423_v26  ;;  %v3812_v47 = vpop.f32.mrb[147].mxu1 }
 0x330   :  { %5322 = vst [vmem:[#allocation9 + $0x30] sm:$0xff] %v5190_v38   ;;  %v4218_v34 = vadd.f32 %v6851_v3, %v3810_v20  ;;  %v6918_v36 = vadd.f32 %v3619_v22, %v6736_v24  ;;  %v3621_v14 = vpop.f32.mrb[83].mxu0  ;;  %v3813_v7 = vadd.f32 %v6779_v28, %v3812_v47 }
 0x331   :  { %v4221_v13 = vadd.f32 %v6851_v3, %v3821_v56  ;;  %v4284_v52 = vmax.f32 %v4220_v21, 0.0 }
 0x332   :  { %v4219_v1 = vadd.f32 %v6851_v3, %v3813_v7  ;;  %v4282_v23 = vmax.f32 %v4218_v34, 0.0 }
 0x333   :  { %v4285_v60 = vmax.f32 %v4221_v13, 0.0 }
 0x334   :  { %v4283_v8 = vmax.f32 %v4219_v1, 0.0  ;;  %v5426_v9 = vpop.f32.mrb[148].mxu1 }
 0x335   :  { %v5205_v62 = vpack.c.bf16 %v4285_v60, %v4284_v52  ;;  %v3624_v29 = vpop.f32.mrb[84].mxu0  ;;  %v3834_v53 = vadd.f32 %v6804_v11, %v5426_v9  ;;  %v3825_v37 = vpop.f32.mrb[149].mxu1 }
 0x336   :  { %v5200_v54 = vpack.c.bf16 %v4283_v8, %v4282_v23  ;;  %v6925_v24 = vadd.f32 %v3624_v29, %v6741_v35  ;;  %v3626_v41 = vpop.f32.mrb[85].mxu0  ;;  %v3826_v28 = vadd.f32 %v6794_v30, %v3825_v37  ;;  %v5427_v45 = vpop.f32.mrb[150].mxu1 }
 0x337   :  { %5325 = vst [vmem:[#allocation9 + $0x48] sm:$0xff] %v5205_v62   ;;  %v4224_v4 = vadd.f32 %v6851_v3, %v3834_v53  ;;  %v3627_v17 = vpop.f32.mrb[86].mxu0  ;;  %v3837_v42 = vadd.f32 %v6809_v40, %v5427_v45  ;;  %v3828_v61 = vpop.f32.mrb[151].mxu1 }
 0x338   :  { %5324 = vst [vmem:[#allocation9 + $0x40] sm:$0xff] %v5200_v54   ;;  %v4222_v33 = vadd.f32 %v6851_v3, %v3826_v28  ;;  %v6932_v11 = vadd.f32 %v3627_v17, %v6746_v44  ;;  %v3629_v55 = vpop.f32.mrb[87].mxu0  ;;  %v3829_v35 = vadd.f32 %v6799_v19, %v3828_v61 }
 0x339   :  { %v4225_v49 = vadd.f32 %v6851_v3, %v3837_v42  ;;  %v4288_v15 = vmax.f32 %v4224_v4, 0.0 }
 0x33a   :  { %v4223_v30 = vadd.f32 %v6851_v3, %v3829_v35  ;;  %v4286_v16 = vmax.f32 %v4222_v33, 0.0 }
 0x33b   :  { %v4289_v57 = vmax.f32 %v4225_v49, 0.0 }
 0x33c   :  { %v4287_v38 = vmax.f32 %v4223_v30, 0.0  ;;  %v5430_v50 = vpop.f32.mrb[152].mxu1 }
 0x33d   :  { %v5215_v40 = vpack.c.bf16 %v4289_v57, %v4288_v15  ;;  %v3632_v20 = vpop.f32.mrb[88].mxu0  ;;  %v3850_v26 = vadd.f32 %v6824_v48, %v5430_v50  ;;  %v3841_v21 = vpop.f32.mrb[153].mxu1 }
 0x33e   :  { %v5210_v22 = vpack.c.bf16 %v4287_v38, %v4286_v16  ;;  %v6939_v44 = vadd.f32 %v3632_v20, %v6751_v5  ;;  %v3634_v56 = vpop.f32.mrb[89].mxu0  ;;  %v3842_v19 = vadd.f32 %v6814_v39, %v3841_v21  ;;  %v5431_v47 = vpop.f32.mrb[154].mxu1 }
 0x33f   :  { %5327 = vst [vmem:[#allocation9 + $0x58] sm:$0xff] %v5215_v40   ;;  %v4228_v34 = vadd.f32 %v6851_v3, %v3850_v26  ;;  %v3635_v14 = vpop.f32.mrb[90].mxu0  ;;  %v3853_v7 = vadd.f32 %v6829_v59, %v5431_v47  ;;  %v3844_v13 = vpop.f32.mrb[155].mxu1  ;;  %v7086_v56 = vld [vmem:[#allocation30_spill] sm:$0xff] }
 0x340   :  { %5326 = vst [vmem:[#allocation9 + $0x50] sm:$0xff] %v5210_v22   ;;  %v4226_v1 = vadd.f32 %v6851_v3, %v3842_v19  ;;  %v6946_v48 = vadd.f32 %v3635_v14, %v6756_v10  ;;  %v3637_v52 = vpop.f32.mrb[91].mxu0  ;;  %v3845_v5 = vadd.f32 %v6819_v6, %v3844_v13 }
 0x341   :  { %v4229_v60 = vadd.f32 %v6851_v3, %v3853_v7  ;;  %v4292_v23 = vmax.f32 %v4228_v34, 0.0 }
 0x342   :  { %v4227_v39 = vadd.f32 %v6851_v3, %v3845_v5  ;;  %v4290_v9 = vmax.f32 %v4226_v1, 0.0 }
 0x343   :  { %v4293_v8 = vmax.f32 %v4229_v60, 0.0 }
 0x344   :  { %v4291_v62 = vmax.f32 %v4227_v39, 0.0  ;;  %v5434_v29 = vpop.f32.mrb[156].mxu1 }
 0x345   :  { %v5225_v59 = vpack.c.bf16 %v4293_v8, %v4292_v23  ;;  %v3640_v53 = vpop.f32.mrb[92].mxu0  ;;  %v3866_v37 = vadd.f32 %v6844_v12, %v5434_v29  ;;  %v3857_v54 = vpop.f32.mrb[157].mxu1 }
 0x346   :  { %v5220_v41 = vpack.c.bf16 %v4291_v62, %v4290_v9  ;;  %v6953_v10 = vadd.f32 %v3640_v53, %v6761_v31  ;;  %v3642_v28 = vpop.f32.mrb[93].mxu0  ;;  %v3858_v6 = vadd.f32 %v6834_v63, %v3857_v54  ;;  %v5435_v45 = vpop.f32.mrb[158].mxu1  ;;  %v7084_v31 = vld [vmem:[#allocation27_spill] sm:$0xff] }
 0x347   :  { %5329 = vst [vmem:[#allocation9 + $0x68] sm:$0xff] %v5225_v59   ;;  %v4232_v4 = vadd.f32 %v6851_v3, %v3866_v37  ;;  %v3643_v17 = vpop.f32.mrb[94].mxu0  ;;  %v3869_v42 = vadd.f32 %v6849_v18, %v5435_v45  ;;  %v3860_v61 = vpop.f32.mrb[159].mxu1  ;;  %v7088_v28 = vld [vmem:[#allocation15_spill] sm:$0xff] }
 0x348   :  { %5328 = vst [vmem:[#allocation9 + $0x60] sm:$0xff] %v5220_v41   ;;  %v4230_v33 = vadd.f32 %v6851_v3, %v3858_v6  ;;  %v6960_v12 = vadd.f32 %v3643_v17, %v6766_v2  ;;  %v3645_v55 = vpop.f32.mrb[95].mxu0  ;;  %v3861_v35 = vadd.f32 %v7084_v31, %v3860_v61  ;;  %v7085_v2 = vld [vmem:[#allocation13_spill] sm:$0xff] }
 0x349   :  { %v4233_v49 = vadd.f32 %v6851_v3, %v3869_v42  ;;  %v4296_v30 = vmax.f32 %v4232_v4, 0.0 }
 0x34a   :  { %v4231_v63 = vadd.f32 %v6851_v3, %v3861_v35  ;;  %v4294_v57 = vmax.f32 %v4230_v33, 0.0 }
 0x34b   :  { %v4297_v15 = vmax.f32 %v4233_v49, 0.0 }
 0x34c   :  { %v4295_v16 = vmax.f32 %v4231_v63, 0.0  ;;  %v5438_v38 = vpop.f32.mrb[160].mxu1 }
 0x34d   :  { %v5235_v18 = vpack.c.bf16 %v4297_v15, %v4296_v30  ;;  %v3648_v50 = vpop.f32.mrb[96].mxu0  ;;  %v3882_v40 = vadd.f32 %v6869_v0, %v5438_v38  ;;  %v3873_v20 = vpop.f32.mrb[161].mxu1  ;;  %v7087_v0 = vld [vmem:[#allocation14_spill] sm:$0xff] }
 0x34e   :  { %v5230_v26 = vpack.c.bf16 %v4295_v16, %v4294_v57  ;;  %v6967_v21 = vadd.f32 %v3648_v50, %v7085_v2  ;;  %v3650_v22 = vpop.f32.mrb[97].mxu0  ;;  %v3874_v19 = vadd.f32 %v7086_v56, %v3873_v20  ;;  %v5439_v47 = vpop.f32.mrb[162].mxu1 }
 0x34f   :  { %5331 = vst [vmem:[#allocation9 + $0x78] sm:$0xff] %v5235_v18   ;;  %v4236_v34 = vadd.f32 %v6851_v3, %v3882_v40  ;;  %v3651_v14 = vpop.f32.mrb[98].mxu0  ;;  %v3885_v7 = vadd.f32 %v6876_v46, %v5439_v47  ;;  %v3876_v13 = vpop.f32.mrb[163].mxu1 }
 0x350   :  { %5330 = vst [vmem:[#allocation9 + $0x70] sm:$0xff] %v5230_v26   ;;  %v4234_v1 = vadd.f32 %v6851_v3, %v3874_v19  ;;  %v6974_v52 = vadd.f32 %v3651_v14, %v7087_v0  ;;  %v3653_v5 = vpop.f32.mrb[99].mxu0  ;;  %v3877_v60 = vadd.f32 %v6862_v27, %v3876_v13  ;;  %v7090_v26 = vld [vmem:[#allocation17_spill] sm:$0xff] }
 0x351   :  { %v4237_v39 = vadd.f32 %v6851_v3, %v3885_v7  ;;  %v4300_v8 = vmax.f32 %v4236_v34, 0.0 }
 0x352   :  { %v4235_v23 = vadd.f32 %v6851_v3, %v3877_v60  ;;  %v4298_v62 = vmax.f32 %v4234_v1, 0.0 }
 0x353   :  { %v4301_v9 = vmax.f32 %v4237_v39, 0.0 }
 0x354   :  { %v4299_v29 = vmax.f32 %v4235_v23, 0.0  ;;  %v5442_v59 = vpop.f32.mrb[164].mxu1 }
 0x355   :  { %v5245_v46 = vpack.c.bf16 %v4301_v9, %v4300_v8  ;;  %v3656_v53 = vpop.f32.mrb[100].mxu0  ;;  %v3898_v37 = vadd.f32 %v6897_v25, %v5442_v59  ;;  %v3889_v54 = vpop.f32.mrb[165].mxu1  ;;  %v7089_v25 = vld [vmem:[#allocation16_spill] sm:$0xff] }
 0x356   :  { %v5240_v41 = vpack.c.bf16 %v4299_v29, %v4298_v62  ;;  %v6981_v6 = vadd.f32 %v3656_v53, %v7088_v28  ;;  %v3658_v45 = vpop.f32.mrb[101].mxu0  ;;  %v3890_v27 = vadd.f32 %v6883_v58, %v3889_v54  ;;  %v5443_v4 = vpop.f32.mrb[166].mxu1  ;;  %v7092_v53 = vld [vmem:[#allocation19_spill] sm:$0xff] }
 0x357   :  { %5333 = vst [vmem:[#allocation9 + $0x88] sm:$0xff] %v5245_v46   ;;  %v4240_v17 = vadd.f32 %v6851_v3, %v3898_v37  ;;  %v3659_v42 = vpop.f32.mrb[102].mxu0  ;;  %v3901_v61 = vadd.f32 %v6904_v32, %v5443_v4  ;;  %v3892_v33 = vpop.f32.mrb[167].mxu1 }
 0x358   :  { %5332 = vst [vmem:[#allocation9 + $0x80] sm:$0xff] %v5240_v41   ;;  %v4238_v55 = vadd.f32 %v6851_v3, %v3890_v27  ;;  %v6988_v31 = vadd.f32 %v3659_v42, %v7089_v25  ;;  %v3661_v35 = vpop.f32.mrb[103].mxu0  ;;  %v3893_v49 = vadd.f32 %v6890_v43, %v3892_v33  ;;  %v7093_v42 = vld [vmem:[#allocation20_spill] sm:$0xff] }
 0x359   :  { %v4241_v63 = vadd.f32 %v6851_v3, %v3901_v61  ;;  %v4304_v30 = vmax.f32 %v4240_v17, 0.0 }
 0x35a   :  { %v4239_v58 = vadd.f32 %v6851_v3, %v3893_v49  ;;  %v4302_v57 = vmax.f32 %v4238_v55, 0.0 }
 0x35b   :  { %v4305_v15 = vmax.f32 %v4241_v63, 0.0 }
 0x35c   :  { %v4303_v16 = vmax.f32 %v4239_v58, 0.0  ;;  %v5446_v38 = vpop.f32.mrb[168].mxu1 }
 0x35d   :  { %v5255_v32 = vpack.c.bf16 %v4305_v15, %v4304_v30  ;;  %v3664_v18 = vpop.f32.mrb[104].mxu0  ;;  %v3914_v50 = vadd.f32 %v6925_v24, %v5446_v38  ;;  %v3905_v40 = vpop.f32.mrb[169].mxu1  ;;  %v7091_v24 = vld [vmem:[#allocation18_spill] sm:$0xff]  ;;  %v7094_v38 = vld [vmem:[#allocation21_spill] sm:$0xff] }
 0x35e   :  { %v5250_v20 = vpack.c.bf16 %v4303_v16, %v4302_v57  ;;  %v6995_v2 = vadd.f32 %v3664_v18, %v7090_v26  ;;  %v3666_v22 = vpop.f32.mrb[105].mxu0  ;;  %v3906_v43 = vadd.f32 %v6911_v51, %v3905_v40  ;;  %v5447_v56 = vpop.f32.mrb[170].mxu1 }
 0x35f   :  { %5335 = vst [vmem:[#allocation9 + $0x98] sm:$0xff] %v5255_v32   ;;  %v4244_v19 = vadd.f32 %v6851_v3, %v3914_v50  ;;  %v3667_v47 = vpop.f32.mrb[106].mxu0  ;;  %v3917_v34 = vadd.f32 %v6932_v11, %v5447_v56  ;;  %v3908_v14 = vpop.f32.mrb[171].mxu1  ;;  %v7095_v56 = vld [vmem:[#allocation22_spill] sm:$0xff] }
 0x360   :  { %5334 = vst [vmem:[#allocation9 + $0x90] sm:$0xff] %v5250_v20   ;;  %v4242_v7 = vadd.f32 %v6851_v3, %v3906_v43  ;;  %v7002_v13 = vadd.f32 %v3667_v47, %v7091_v24  ;;  %v3669_v1 = vpop.f32.mrb[107].mxu0  ;;  %v3909_v0 = vadd.f32 %v6918_v36, %v3908_v14 }
 0x361   :  { %v4245_v5 = vadd.f32 %v6851_v3, %v3917_v34  ;;  %v4308_v60 = vmax.f32 %v4244_v19, 0.0 }
 0x362   :  { %v4243_v51 = vadd.f32 %v6851_v3, %v3909_v0  ;;  %v4306_v23 = vmax.f32 %v4242_v7, 0.0 }
 0x363   :  { %v4309_v39 = vmax.f32 %v4245_v5, 0.0 }
 0x364   :  { %v4307_v8 = vmax.f32 %v4243_v51, 0.0  ;;  %v5450_v9 = vpop.f32.mrb[172].mxu1 }
 0x365   :  { %v5265_v11 = vpack.c.bf16 %v4309_v39, %v4308_v60  ;;  %v3672_v62 = vpop.f32.mrb[108].mxu0  ;;  %v3930_v29 = vadd.f32 %v6953_v10, %v5450_v9  ;;  %v3921_v59 = vpop.f32.mrb[173].mxu1 }
 0x366   :  { %v5260_v46 = vpack.c.bf16 %v4307_v8, %v4306_v23  ;;  %v5554_v37 = vadd.f32 %v3672_v62, %v7092_v53  ;;  %v3674_v54 = vpop.f32.mrb[109].mxu0  ;;  %v3922_v36 = vadd.f32 %v6939_v44, %v3921_v59  ;;  %v5451_v41 = vpop.f32.mrb[174].mxu1  ;;  %v7096_v23 = vld [vmem:[#allocation23_spill] sm:$0xff] }
 0x367   :  { %5337 = vst [vmem:[#allocation9 + $0xa8] sm:$0xff] %v5265_v11   ;;  %v4248_v28 = vadd.f32 %v6851_v3, %v3930_v29  ;;  %v3675_v45 = vpop.f32.mrb[110].mxu0  ;;  %v3933_v27 = vadd.f32 %v6960_v12, %v5451_v41  ;;  %v3924_v4 = vpop.f32.mrb[175].mxu1  ;;  %v7097_v54 = vld [vmem:[#allocation24_spill] sm:$0xff] }
 0x368   :  { %5336 = vst [vmem:[#allocation9 + $0xa0] sm:$0xff] %v5260_v46   ;;  %v4246_v17 = vadd.f32 %v6851_v3, %v3922_v36  ;;  %v5555_v10 = vadd.f32 %v3675_v45, %v7093_v42  ;;  %v3677_v61 = vpop.f32.mrb[111].mxu0  ;;  %v3925_v33 = vadd.f32 %v6946_v48, %v3924_v4 }
 0x369   :  { %v4249_v55 = vadd.f32 %v6851_v3, %v3933_v27  ;;  %v4312_v25 = vmax.f32 %v4248_v28, 0.0 }
 0x36a   :  { %v4247_v44 = vadd.f32 %v6851_v3, %v3925_v33  ;;  %v4310_v49 = vmax.f32 %v4246_v17, 0.0 }
 0x36b   :  { %v4313_v35 = vmax.f32 %v4249_v55, 0.0 }
 0x36c   :  { %v4311_v63 = vmax.f32 %v4247_v44, 0.0  ;;  %v5454_v58 = vpop.f32.mrb[176].mxu1 }
 0x36d   :  { %v5275_v30 = vpack.c.bf16 %v4313_v35, %v4312_v25  ;;  %v3680_v12 = vpop.f32.mrb[112].mxu0  ;;  %v3946_v15 = vadd.f32 %v6981_v6, %v5454_v58  ;;  %v3937_v57 = vpop.f32.mrb[177].mxu1  ;;  %v7098_v25 = vld [vmem:[#allocation25_spill] sm:$0xff] }
 0x36e   :  { %v5270_v16 = vpack.c.bf16 %v4311_v63, %v4310_v49  ;;  %v5556_v32 = vadd.f32 %v3680_v12, %v7094_v38  ;;  %v3682_v18 = vpop.f32.mrb[113].mxu0  ;;  %v3938_v48 = vadd.f32 %v6967_v21, %v3937_v57  ;;  %v5455_v50 = vpop.f32.mrb[178].mxu1 }
 0x36f   :  { %5339 = vst [vmem:[#allocation9 + $0xb8] sm:$0xff] %v5275_v30   ;;  %v4252_v40 = vadd.f32 %v6851_v3, %v3946_v15  ;;  %v3683_v20 = vpop.f32.mrb[114].mxu0  ;;  %v3949_v26 = vadd.f32 %v6988_v31, %v5455_v50  ;;  %v3940_v22 = vpop.f32.mrb[179].mxu1 }
 0x370   :  { %5338 = vst [vmem:[#allocation9 + $0xb0] sm:$0xff] %v5270_v16   ;;  %v4250_v43 = vadd.f32 %v6851_v3, %v3938_v48  ;;  %v5557_v6 = vadd.f32 %v3683_v20, %v7095_v56  ;;  %v3685_v19 = vpop.f32.mrb[115].mxu0  ;;  %v3941_v47 = vadd.f32 %v6974_v52, %v3940_v22  ;;  %v7099_v16 = vld [vmem:[#allocation26_spill] sm:$0xff] }
 0x371   :  { %v4253_v34 = vadd.f32 %v6851_v3, %v3949_v26  ;;  %v4316_v14 = vmax.f32 %v4252_v40, 0.0 }
 0x372   :  { %v4251_v21 = vadd.f32 %v6851_v3, %v3941_v47  ;;  %v4314_v24 = vmax.f32 %v4250_v43, 0.0 }
 0x373   :  { %v4317_v7 = vmax.f32 %v4253_v34, 0.0 }
 0x374   :  { %v4315_v1 = vmax.f32 %v4251_v21, 0.0  ;;  %v5458_v0 = vpop.f32.mrb[180].mxu1  ;;  %v7100_v21 = vld [vmem:[#allocation28_spill] sm:$0xff] }
 0x375   :  { %v5285_v5 = vpack.c.bf16 %v4317_v7, %v4316_v14  ;;  %v3688_v31 = vpop.f32.mrb[116].mxu0  ;;  %v3962_v51 = vadd.f32 %v5554_v37, %v5458_v0  ;;  %v3953_v60 = vpop.f32.mrb[181].mxu1 }
 0x376   :  { %v5280_v39 = vpack.c.bf16 %v4315_v1, %v4314_v24  ;;  %v5558_v8 = vadd.f32 %v3688_v31, %v7096_v23  ;;  %v3690_v9 = vpop.f32.mrb[117].mxu0  ;;  %v3954_v11 = vadd.f32 %v6995_v2, %v3953_v60  ;;  %v5459_v52 = vpop.f32.mrb[182].mxu1 }
 0x377   :  { %5341 = vst [vmem:[#allocation9 + $0xc8] sm:$0xff] %v5285_v5   ;;  %v4256_v62 = vadd.f32 %v6851_v3, %v3962_v51  ;;  %v3691_v29 = vpop.f32.mrb[118].mxu0  ;;  %v3965_v59 = vadd.f32 %v5555_v10, %v5459_v52  ;;  %v3956_v46 = vpop.f32.mrb[183].mxu1  ;;  %v7101_v51 = vld [vmem:[#allocation29_spill] sm:$0xff] }
 0x378   :  { %5340 = vst [vmem:[#allocation9 + $0xc0] sm:$0xff] %v5280_v39   ;;  %v4254_v53 = vadd.f32 %v6851_v3, %v3954_v11  ;;  %v5559_v36 = vadd.f32 %v3691_v29, %v7097_v54  ;;  %v3693_v37 = vpop.f32.mrb[119].mxu0  ;;  %v3957_v41 = vadd.f32 %v7002_v13, %v3956_v46 }
 0x379   :  { %v4257_v28 = vadd.f32 %v6851_v3, %v3965_v59  ;;  %v4320_v2 = vmax.f32 %v4256_v62, 0.0 }
 0x37a   :  { %v4255_v45 = vadd.f32 %v6851_v3, %v3957_v41  ;;  %v4318_v4 = vmax.f32 %v4254_v53, 0.0 }
 0x37b   :  { %v4321_v27 = vmax.f32 %v4257_v28, 0.0 }
 0x37c   :  { %v4319_v17 = vmax.f32 %v4255_v45, 0.0  ;;  %v5462_v42 = vpop.f32.mrb[184].mxu1 }
 0x37d   :  { %v5295_v61 = vpack.c.bf16 %v4321_v27, %v4320_v2  ;;  %v3696_v10 = vpop.f32.mrb[120].mxu0  ;;  %v3978_v33 = vadd.f32 %v5558_v8, %v5462_v42  ;;  %v3969_v55 = vpop.f32.mrb[185].mxu1 }
 0x37e   :  { %v5290_v44 = vpack.c.bf16 %v4319_v17, %v4318_v4  ;;  %v5560_v35 = vadd.f32 %v3696_v10, %v7098_v25  ;;  %v3698_v49 = vpop.f32.mrb[121].mxu0  ;;  %v3970_v63 = vadd.f32 %v5556_v32, %v3969_v55  ;;  %v5463_v58 = vpop.f32.mrb[186].mxu1 }
 0x37f   :  { %5343 = vst [vmem:[#allocation9 + $0xd8] sm:$0xff] %v5295_v61   ;;  %v4260_v13 = vadd.f32 %v6851_v3, %v3978_v33  ;;  %v3699_v30 = vpop.f32.mrb[122].mxu0  ;;  %v3981_v12 = vadd.f32 %v5559_v36, %v5463_v58  ;;  %v3972_v15 = vpop.f32.mrb[187].mxu1 }
 0x380   :  { %5342 = vst [vmem:[#allocation9 + $0xd0] sm:$0xff] %v5290_v44   ;;  %v4258_v57 = vadd.f32 %v6851_v3, %v3970_v63  ;;  %v5561_v38 = vadd.f32 %v3699_v30, %v7099_v16  ;;  %v3701_v18 = vpop.f32.mrb[123].mxu0  ;;  %v3973_v48 = vadd.f32 %v5557_v6, %v3972_v15 }
 0x381   :  { %v4261_v50 = vadd.f32 %v6851_v3, %v3981_v12  ;;  %v4324_v20 = vmax.f32 %v4260_v13, 0.0 }
 0x382   :  { %v4259_v40 = vadd.f32 %v6851_v3, %v3973_v48  ;;  %v4322_v26 = vmax.f32 %v4258_v57, 0.0 }
 0x383   :  { %v4325_v32 = vmax.f32 %v4261_v50, 0.0 }
 0x384   :  { %v4323_v22 = vmax.f32 %v4259_v40, 0.0  ;;  %v5466_v43 = vpop.f32.mrb[188].mxu1 }
 0x385   :  { %v5305_v56 = vpack.c.bf16 %v4325_v32, %v4324_v20  ;;  %v3704_v19 = vpop.f32.mrb[124].mxu0  ;;  %v3985_v47 = vpop.f32.mrb[189].mxu1 }
 0x386   :  { %v5300_v34 = vpack.c.bf16 %v4323_v22, %v4322_v26  ;;  %v5562_v14 = vadd.f32 %v3704_v19, %v7100_v21  ;;  %v3706_v7 = vpop.f32.mrb[125].mxu0  ;;  %v3986_v24 = vadd.f32 %v5560_v35, %v3985_v47  ;;  %v5467_v1 = vpop.f32.mrb[190].mxu1 }
 0x387   :  { %5345 = vst [vmem:[#allocation9 + $0xe8] sm:$0xff] %v5305_v56   ;;  %v3707_v6 = vpop.f32.mrb[126].mxu0  ;;  %v3988_v0 = vpop.f32.mrb[191].mxu1 }
 0x388   :  { %5344 = vst [vmem:[#allocation9 + $0xe0] sm:$0xff] %v5300_v34   ;;  %v3994_v5 = vadd.f32 %v5562_v14, %v5466_v43  ;;  %v4262_v31 = vadd.f32 %v6851_v3, %v3986_v24  ;;  %v5563_v60 = vadd.f32 %v3707_v6, %v7101_v51  ;;  %v3709_v39 = vpop.f32.mrb[127].mxu0  ;;  %v3989_v23 = vadd.f32 %v5561_v38, %v3988_v0 }
 0x38a   :  { %v4264_v8 = vadd.f32 %v6851_v3, %v3994_v5  ;;  %v3997_v9 = vadd.f32 %v5563_v60, %v5467_v1  ;;  %v4263_v11 = vadd.f32 %v6851_v3, %v3989_v23  ;;  %v4326_v52 = vmax.f32 %v4262_v31, 0.0 }
 0x38c   :  { %v4265_v62 = vadd.f32 %v6851_v3, %v3997_v9  ;;  %v4327_v29 = vmax.f32 %v4263_v11, 0.0  ;;  %v4328_v59 = vmax.f32 %v4264_v8, 0.0 }
 0x38e   :  { %v4329_v46 = vmax.f32 %v4265_v62, 0.0  ;;  %v5310_v53 = vpack.c.bf16 %v4327_v29, %v4326_v52 }
 0x390   :  { %v5315_v54 = vpack.c.bf16 %v4329_v46, %v4328_v59  ;;  %5346 = vst [vmem:[#allocation9 + $0xf0] sm:$0xff] %v5310_v53  }
 0x392   :  { %5347 = vst [vmem:[#allocation9 + $0xf8] sm:$0xff] %v5315_v54  }
 0x393   :  { %6394 = shalt.err (!%p6391_p0)
}
 0x394   :  { %s6395_s30 = scalar_lea.hbm %s7065_s3, 4096 }
 0x395   :  { %p6396_p1 = scmp.ne.s32.totalorder %s7065_s3, %s6395_s30  ;;  %p6399_p2 = scmp.lt.u32.totalorder %s6395_s30, %s7065_s3 }
 0x397   :  { %p6401_p3 = pnand %p6399_p2, %p6396_p1 }
 0x399   :  { %6404 = shalt.err (!%p6401_p3)
}
 0x39a   :  { %4661 = dma.vmem_to_hbm [thread:$0]  %s4656_s26, 4096, %s7065_s3, [#allocation5], %s6412_s22, %s6412_s22, %s6413_s23  }
 0x39b   :  { %6409 = dma.done.wait [#allocation5], 4096  }
 0x39c   :  { %6410 = vsyncadd [#allocation5], 4294963200 }
 0x39d   :  { %4665 = vsyncpa [#allocation4], 1 }
 0x39e   :  { %4666 = vsyncpa [#allocation7], 1 }
 0x39f   :  { %4667 = vsyncpa [#allocation5], 1 }

</bundles_post_ra>
